<compile_context>
chip_gen: v7x
topology: tpu7x:2x2x1
jax: 0.10.0
libtpu: 0.0.40
codegen_flags: <defaults>
</compile_context>

<pallas_src>
import jax
import jax.numpy as jnp
from jax.experimental import pallas as pl
from jax.experimental.pallas import tpu as pltpu

_H1 = 512
_H2 = 256


def _round_up(x, m):
    return ((x + m - 1) // m) * m


def _discriminator_kernel(x_ref, w1_ref, b1_ref, w2_ref, b2_ref, w3_ref, b3_ref,
                          out_ref, acc_ref):
    """Fused 3-layer MLP + LeakyReLU(0.2) + Sigmoid, K-tiled on layer 1."""
    k = pl.program_id(1)

    @pl.when(k == 0)
    def _():
        acc_ref[...] = jnp.zeros_like(acc_ref)

    # Layer 1 partial product: (TILE_B, TK) @ (TK, 512) on the MXU.
    acc_ref[...] += jnp.dot(x_ref[...], w1_ref[...],
                            preferred_element_type=jnp.float32)

    @pl.when(k == pl.num_programs(1) - 1)
    def _():
        h1 = acc_ref[...] + b1_ref[...]
        h1 = jnp.where(h1 >= 0.0, h1, 0.2 * h1)              # LeakyReLU(0.2)

        # Layer 2: (TILE_B, 512) @ (512, 256)
        h2 = jnp.dot(h1, w2_ref[...], preferred_element_type=jnp.float32)
        h2 = h2 + b2_ref[...]
        h2 = jnp.where(h2 >= 0.0, h2, 0.2 * h2)              # LeakyReLU(0.2)

        # Layer 3: output width 1 -> lane reduction (keeps the MXU out of the
        # epilogue; w3 is passed as a (1, 256) row).
        logits = jnp.sum(h2 * w3_ref[...], axis=-1, keepdims=True) + b3_ref[...]
        out_ref[...] = jax.nn.sigmoid(logits).astype(out_ref.dtype)


def discriminator_forward(img, params):
    """img: (B, C, H, W) float32.  Returns validity: (B, 1) float32."""
    w1, b1, w2, b2, w3, b3 = params
    B = img.shape[0]
    F = int(img.shape[1] * img.shape[2] * img.shape[3])
    x = img.reshape(B, F).astype(jnp.float32)   # matches torch .view(B, -1)

    # ---- tile sizes -------------------------------------------------------
    # Batch tile: at least 8 sublanes, up to 256 (MXU tile height on v6e/v7x).
    TILE_B = 256 if B >= 256 else _round_up(B, 8)
    B_pad = _round_up(B, TILE_B)
    # K (reduction) tile for layer 1: lane-aligned, 512 amortizes per-step cost.
    TK = min(512, _round_up(F, 128))
    F_pad = _round_up(F, TK)

    # Zero-pad batch / reduction dims (zeros contribute nothing to the dot).
    if (B_pad, F_pad) != (B, F):
        x = jnp.pad(x, ((0, B_pad - B), (0, F_pad - F)))
    w1p = jnp.pad(w1, ((0, F_pad - F), (0, 0))) if F_pad != F else w1
    w3_row = w3.reshape(1, _H2)                 # (256, 1) -> (1, 256)

    n_b = B_pad // TILE_B
    n_k = F_pad // TK

    # ---- VMEM budget (bytes), sized from the actual tiles -----------------
    f32 = 4
    needed = (
        2 * TILE_B * TK * f32            # x tile (double-buffered)
        + 2 * TK * _H1 * f32             # w1 tile (double-buffered)
        + 2 * _H1 * _H2 * f32            # w2 (resident; x2 for safety)
        + 2 * (_H1 + _H2 + _H2 + 1) * f32  # b1, b2, w3 row, b3
        + 2 * TILE_B * 1 * f32           # out tile
        + TILE_B * _H1 * f32             # accumulator scratch
    )
    vmem_limit = min(max(int(needed * 1.25) + (2 << 20), 8 << 20), 48 << 20)

    out_padded = pl.pallas_call(
        _discriminator_kernel,
        out_shape=jax.ShapeDtypeStruct((B_pad, 1), jnp.float32),
        grid_spec=pltpu.PrefetchScalarGridSpec(
            num_scalar_prefetch=0,
            grid=(n_b, n_k),
            in_specs=[
                pl.BlockSpec((TILE_B, TK), lambda i, k: (i, k)),   # x tile
                pl.BlockSpec((TK, _H1),    lambda i, k: (k, 0)),   # w1 tile
                pl.BlockSpec((1, _H1),     lambda i, k: (0, 0)),   # b1 (resident)
                pl.BlockSpec((_H1, _H2),   lambda i, k: (0, 0)),   # w2 (resident)
                pl.BlockSpec((1, _H2),     lambda i, k: (0, 0)),   # b2 (resident)
                pl.BlockSpec((1, _H2),     lambda i, k: (0, 0)),   # w3 row (resident)
                pl.BlockSpec((1, 1),       lambda i, k: (0, 0)),   # b3 (resident)
            ],
            out_specs=pl.BlockSpec((TILE_B, 1), lambda i, k: (i, 0)),
            scratch_shapes=[pltpu.VMEM((TILE_B, _H1), jnp.float32)],
        ),
        compiler_params=pltpu.CompilerParams(
            dimension_semantics=("parallel", "arbitrary"),
            vmem_limit_bytes=vmem_limit,
        ),
    )(x, w1p, b1, w2, b2, w3_row, b3)

    return out_padded[:B]


def init_params(key, in_features):
    """Deterministic init mimicking nn.Linear shapes.

    PyTorch stores Linear weight as (out, in); we store the transpose
    (in, out) so the kernel does x @ W directly.  Biases are (1, out) rows.
    """
    dims = [(in_features, _H1), (_H1, _H2), (_H2, 1)]
    params = []
    for i, (fin, fout) in enumerate(dims):
        kw, kb = jax.random.split(jax.random.fold_in(key, i))
        bound = 1.0 / jnp.sqrt(jnp.float32(fin))
        w = jax.random.uniform(kw, (fin, fout), jnp.float32, -bound, bound)
        b = jax.random.uniform(kb, (1, fout), jnp.float32, -bound, bound)
        params += [w, b]
    return tuple(params)


def _reference_forward(img, params):
    """Plain-JAX reference for correctness checking."""
    w1, b1, w2, b2, w3, b3 = params
    x = img.reshape(img.shape[0], -1)
    h1 = x @ w1 + b1
    h1 = jnp.where(h1 >= 0, h1, 0.2 * h1)
    h2 = h1 @ w2 + b2
    h2 = jnp.where(h2 >= 0, h2, 0.2 * h2)
    return jax.nn.sigmoid(h2 @ w3 + b3)


if __name__ == "__main__":
    key = jax.random.PRNGKey(0)
    k_img, k_param = jax.random.split(key)

    # img_shape = (C, H, W) = (4, 16, 16)  -> 1024 input features
    B, C, H, W = 2, 4, 16, 16
    img = jax.random.normal(k_img, (B, C, H, W), jnp.float32)
    params = init_params(k_param, C * H * W)

    out = discriminator_forward(img, params)
    out = jax.block_until_ready(out)

    ref = _reference_forward(img, params)
    assert out.shape == (B, 1)
    assert jnp.allclose(out, ref, atol=1e-4, rtol=1e-4)

    print("KERNEL_OK")
</pallas_src>

<mosaic_0001>
module attributes {stable_mosaic.version = 11 : i64} {
  func.func @_discriminator_kernel(%arg0: i32, %arg1: i32, %arg2: memref<8x512xf32, #tpu.memory_space<vmem>>, %arg3: memref<512x512xf32, #tpu.memory_space<vmem>>, %arg4: memref<1x512xf32, #tpu.memory_space<vmem>>, %arg5: memref<512x256xf32, #tpu.memory_space<vmem>>, %arg6: memref<1x256xf32, #tpu.memory_space<vmem>>, %arg7: memref<1x256xf32, #tpu.memory_space<vmem>>, %arg8: memref<1x1xf32, #tpu.memory_space<vmem>>, %arg9: memref<8x1xf32, #tpu.memory_space<vmem>>, %arg10: memref<8x512xf32, #tpu.memory_space<vmem>>) attributes {dimension_semantics = [#tpu.dimension_semantics<parallel>, #tpu.dimension_semantics<arbitrary>], iteration_bounds = array<i64: 1, 2>, scalar_prefetch = 0 : i64, scratch_operands = 1 : i64, tpu.core_type = #tpu.core_type<tc>, window_params = [{transform_indices = @transform_0, window_bounds = array<i64: 8, 512>}, {transform_indices = @transform_1, window_bounds = array<i64: 512, 512>}, {pipeline_mode = #tpu.pipeline_mode<synchronous>, transform_indices = @transform_2, window_bounds = array<i64: 1, 512>}, {pipeline_mode = #tpu.pipeline_mode<synchronous>, transform_indices = @transform_3, window_bounds = array<i64: 512, 256>}, {pipeline_mode = #tpu.pipeline_mode<synchronous>, transform_indices = @transform_4, window_bounds = array<i64: 1, 256>}, {pipeline_mode = #tpu.pipeline_mode<synchronous>, transform_indices = @transform_5, window_bounds = array<i64: 1, 256>}, {pipeline_mode = #tpu.pipeline_mode<synchronous>, transform_indices = @transform_6, window_bounds = array<i64: 1, 1>}, {transform_indices = @transform_7, window_bounds = array<i64: 8, 1>}]} {
    %c0_i32 = arith.constant 0 : i32
    %0 = arith.cmpi eq, %arg1, %c0_i32 : i32
    %1 = arith.extui %0 : i1 to i32
    %c0_i32_0 = arith.constant 0 : i32
    %2 = arith.cmpi ne, %1, %c0_i32_0 : i32
    scf.if %2 {
      %cst_9 = arith.constant 0.000000e+00 : f32
      %12 = vector.broadcast %cst_9 : f32 to vector<8x512xf32>
      %c0_10 = arith.constant 0 : index
      %c0_11 = arith.constant 0 : index
      %13 = vector.load %arg10[%c0_10, %c0_11] : memref<8x512xf32, #tpu.memory_space<vmem>>, vector<8x512xf32>
      tpu.vector_store %arg10[%c0_10, %c0_11], %12 {strides = array<i32>} : memref<8x512xf32, #tpu.memory_space<vmem>>, vector<8x512xf32>,
    } else {
    }
    %c0 = arith.constant 0 : index
    %c0_1 = arith.constant 0 : index
    %3 = vector.load %arg10[%c0, %c0_1] : memref<8x512xf32, #tpu.memory_space<vmem>>, vector<8x512xf32>
    %c0_2 = arith.constant 0 : index
    %c0_3 = arith.constant 0 : index
    %4 = vector.load %arg2[%c0_2, %c0_3] : memref<8x512xf32, #tpu.memory_space<vmem>>, vector<8x512xf32>
    %c0_4 = arith.constant 0 : index
    %c0_5 = arith.constant 0 : index
    %5 = vector.load %arg3[%c0_4, %c0_5] : memref<512x512xf32, #tpu.memory_space<vmem>>, vector<512x512xf32>
    %cst = arith.constant dense<0.000000e+00> : vector<8x512xf32>
    %6 = tpu.matmul %4, %5, %cst {dimension_numbers = #tpu.dot_dimension_numbers<[1], [0], [0], [1], [0, 0, 1, 1], [], []>} : vector<8x512xf32>, vector<512x512xf32>, vector<8x512xf32> -> vector<8x512xf32>
    %7 = arith.addf %3, %6 : vector<8x512xf32>
    %c0_6 = arith.constant 0 : index
    %c0_7 = arith.constant 0 : index
    %8 = vector.load %arg10[%c0_6, %c0_7] : memref<8x512xf32, #tpu.memory_space<vmem>>, vector<8x512xf32>
    tpu.vector_store %arg10[%c0_6, %c0_7], %7 {strides = array<i32>} : memref<8x512xf32, #tpu.memory_space<vmem>>, vector<8x512xf32>,
    %c1_i32 = arith.constant 1 : i32
    %9 = arith.cmpi eq, %arg1, %c1_i32 : i32
    %10 = arith.extui %9 : i1 to i32
    %c0_i32_8 = arith.constant 0 : i32
    %11 = arith.cmpi ne, %10, %c0_i32_8 : i32
    scf.if %11 {
      %c0_9 = arith.constant 0 : index
      %c0_10 = arith.constant 0 : index
      %12 = vector.load %arg10[%c0_9, %c0_10] : memref<8x512xf32, #tpu.memory_space<vmem>>, vector<8x512xf32>
      %c0_11 = arith.constant 0 : index
      %c0_12 = arith.constant 0 : index
      %13 = vector.load %arg4[%c0_11, %c0_12] : memref<1x512xf32, #tpu.memory_space<vmem>>, vector<1x512xf32>
      %14 = vector.broadcast %13 : vector<1x512xf32> to vector<8x512xf32>
      %15 = arith.addf %12, %14 : vector<8x512xf32>
      %cst_13 = arith.constant 0.000000e+00 : f32
      %16 = vector.broadcast %cst_13 : f32 to vector<8x512xf32>
      %17 = arith.cmpf oge, %15, %16 : vector<8x512xf32>
      %cst_14 = arith.constant 2.000000e-01 : f32
      %18 = vector.broadcast %cst_14 : f32 to vector<8x512xf32>
      %19 = arith.mulf %18, %15 : vector<8x512xf32>
      %20 = arith.select %17, %15, %19 : vector<8x512xi1>, vector<8x512xf32>
      %c0_15 = arith.constant 0 : index
      %c0_16 = arith.constant 0 : index
      %21 = vector.load %arg5[%c0_15, %c0_16] : memref<512x256xf32, #tpu.memory_space<vmem>>, vector<512x256xf32>
      %cst_17 = arith.constant dense<0.000000e+00> : vector<8x256xf32>
      %22 = tpu.matmul %20, %21, %cst_17 {dimension_numbers = #tpu.dot_dimension_numbers<[1], [0], [0], [1], [0, 0, 1, 1], [], []>} : vector<8x512xf32>, vector<512x256xf32>, vector<8x256xf32> -> vector<8x256xf32>
      %c0_18 = arith.constant 0 : index
      %c0_19 = arith.constant 0 : index
      %23 = vector.load %arg6[%c0_18, %c0_19] : memref<1x256xf32, #tpu.memory_space<vmem>>, vector<1x256xf32>
      %24 = vector.broadcast %23 : vector<1x256xf32> to vector<8x256xf32>
      %25 = arith.addf %22, %24 : vector<8x256xf32>
      %cst_20 = arith.constant 0.000000e+00 : f32
      %26 = vector.broadcast %cst_20 : f32 to vector<8x256xf32>
      %27 = arith.cmpf oge, %25, %26 : vector<8x256xf32>
      %cst_21 = arith.constant 2.000000e-01 : f32
      %28 = vector.broadcast %cst_21 : f32 to vector<8x256xf32>
      %29 = arith.mulf %28, %25 : vector<8x256xf32>
      %30 = arith.select %27, %25, %29 : vector<8x256xi1>, vector<8x256xf32>
      %c0_22 = arith.constant 0 : index
      %c0_23 = arith.constant 0 : index
      %31 = vector.load %arg7[%c0_22, %c0_23] : memref<1x256xf32, #tpu.memory_space<vmem>>, vector<1x256xf32>
      %32 = vector.broadcast %31 : vector<1x256xf32> to vector<8x256xf32>
      %33 = arith.mulf %30, %32 : vector<8x256xf32>
      %cst_24 = arith.constant dense<0.000000e+00> : vector<8xf32>
      %34 = vector.multi_reduction <add>, %33, %cst_24 [1] : vector<8x256xf32> to vector<8xf32>
      %35 = vector.shape_cast %34 : vector<8xf32> to vector<8x1xf32>
      %c0_25 = arith.constant 0 : index
      %c0_26 = arith.constant 0 : index
      %36 = vector.load %arg8[%c0_25, %c0_26] : memref<1x1xf32, #tpu.memory_space<vmem>>, vector<1x1xf32>
      %37 = vector.broadcast %36 : vector<1x1xf32> to vector<8x1xf32>
      %38 = arith.addf %35, %37 : vector<8x1xf32>
      %39 = arith.negf %38 : vector<8x1xf32>
      %40 = math.exp %39 : vector<8x1xf32>
      %cst_27 = arith.constant 1.000000e+00 : f32
      %41 = vector.broadcast %cst_27 : f32 to vector<8x1xf32>
      %42 = arith.addf %41, %40 : vector<8x1xf32>
      %43 = arith.divf %41, %42 : vector<8x1xf32>
      %c0_28 = arith.constant 0 : index
      %c0_29 = arith.constant 0 : index
      %44 = vector.load %arg9[%c0_28, %c0_29] : memref<8x1xf32, #tpu.memory_space<vmem>>, vector<8x1xf32>
      tpu.vector_store %arg9[%c0_28, %c0_29], %43 {strides = array<i32>} : memref<8x1xf32, #tpu.memory_space<vmem>>, vector<8x1xf32>,
    } else {
    }
    return
  }
  func.func @transform_0(%arg0: i32, %arg1: i32) -> (i32, i32) {
    %c0_i32 = arith.constant 0 : i32
    return %arg0, %arg1 : i32, i32
  }
  func.func @transform_1(%arg0: i32, %arg1: i32) -> (i32, i32) {
    %c0_i32 = arith.constant 0 : i32
    %c0_i32_0 = arith.constant 0 : i32
    return %arg1, %c0_i32 : i32, i32
  }
  func.func @transform_2(%arg0: i32, %arg1: i32) -> (i32, i32) {
    %c0_i32 = arith.constant 0 : i32
    %c0_i32_0 = arith.constant 0 : i32
    %c0_i32_1 = arith.constant 0 : i32
    return %c0_i32, %c0_i32_0 : i32, i32
  }
  func.func @transform_3(%arg0: i32, %arg1: i32) -> (i32, i32) {
    %c0_i32 = arith.constant 0 : i32
    %c0_i32_0 = arith.constant 0 : i32
    %c0_i32_1 = arith.constant 0 : i32
    return %c0_i32, %c0_i32_0 : i32, i32
  }
  func.func @transform_4(%arg0: i32, %arg1: i32) -> (i32, i32) {
    %c0_i32 = arith.constant 0 : i32
    %c0_i32_0 = arith.constant 0 : i32
    %c0_i32_1 = arith.constant 0 : i32
    return %c0_i32, %c0_i32_0 : i32, i32
  }
  func.func @transform_5(%arg0: i32, %arg1: i32) -> (i32, i32) {
    %c0_i32 = arith.constant 0 : i32
    %c0_i32_0 = arith.constant 0 : i32
    %c0_i32_1 = arith.constant 0 : i32
    return %c0_i32, %c0_i32_0 : i32, i32
  }
  func.func @transform_6(%arg0: i32, %arg1: i32) -> (i32, i32) {
    %c0_i32 = arith.constant 0 : i32
    %c0_i32_0 = arith.constant 0 : i32
    %c0_i32_1 = arith.constant 0 : i32
    return %c0_i32, %c0_i32_0 : i32, i32
  }
  func.func @transform_7(%arg0: i32, %arg1: i32) -> (i32, i32) {
    %c0_i32 = arith.constant 0 : i32
    %c0_i32_0 = arith.constant 0 : i32
    return %arg0, %c0_i32 : i32, i32
  }
}

</mosaic_0001>

<bundles_post_ra>
// kernel: tpu_custom_call.1
= control target key start
LH: loop header
LB: loop body
LE: loop exit
PB: predicated region body
PF: predicated region fallthrough
CT: control target
= control target key end

     0   :  { %s2883_s0 = inlined_call_operand.hbm [shape: f32[8,1024], index: 0, kind: input, shape index: {}]   ;;  %s2884_s1 = inlined_call_operand.hbm [shape: f32[1024,512], index: 1, kind: input, shape index: {}]   ;;  %s2885_s2 = inlined_call_operand.hbm [shape: f32[1,512], index: 2, kind: input, shape index: {}]   ;;  %s2886_s3 = inlined_call_operand.hbm [shape: f32[512,256], index: 3, kind: input, shape index: {}]   ;;  %s2887_s4 = inlined_call_operand.hbm [shape: f32[1,256], index: 4, kind: input, shape index: {}]   ;;  %s2888_s5 = inlined_call_operand.hbm [shape: f32[1,256], index: 5, kind: input, shape index: {}]   ;;  %s2889_s6 = inlined_call_operand.<no memory space> [shape: f32[1,1], index: 6, kind: input, shape index: {}]   ;;  %s2890_s7 = inlined_call_operand.vmem [shape: f32[8,1], index: 7, kind: output, shape index: {}]  }
   0x1   :  { %2895 = sst [smem:[#allocation19_spill]] %s2883_s0  ;;  %v12_v0 = vstv %s2889_s6 }
   0x2   :  { %13 = vst [vmem:[#allocation3] sm:$0x1] %v12_v0 }
   0x3   :  { %14 = vsyncpa [#allocation5], 0 }
   0x4   :  { %16 = vsyncpa [#allocation5 + $0x1], 0 }
   0x5   :  { %17 = vsyncpa [#allocation7], 0 }
   0x6   :  { %19 = vsyncpa [#allocation7 + $0x1], 0 }
   0x7   :  { %20 = vsyncpa [#allocation10], 0 }
   0x8   :  { %21 = vsyncpa [#allocation13], 0  ;;  %s2300_s26 = smov 0   ;;  %s2302_s27 = smov 0  }
   0x9   :  { %s2304_s28 = smov 0   ;;  %s2306_s29 = smov 0  }
   0xa   :  { %s2308_s30 = smov 0   ;;  %s2310_s8 = smov 0  }
   0xb LB: > { %s2894_s6 = sadd.s32 4294967295, %s2244_s8   ;;  %p1474_p0 = scmp.ge.s32.totalorder %s2244_s8, 1  ;;  %s2244_s8 = sphi %s2310_s8, %s27_s8   ;;  %s2240_s30 = sphi %s2308_s30, %s2912_s30   ;;  %s2236_s29 = sphi %s2306_s29, %s2911_s29   ;;  %s2232_s28 = sphi %s2304_s28, %s2910_s28   ;;  %s2228_s27 = sphi %s2302_s27, %s2909_s27   ;;  %s2224_s26 = sphi %s2300_s26, %s2908_s26  }
   0xc   : > { %p2334_p1 = scmp.eq.s32.totalorder %s2894_s6, 0  ;;  %p229_p2 = scmp.lt.s32.totalorder %s2244_s8, 3 }
   0xd   : > { %s2246_s11 = smov [#allocation8]   ;;  %s2247_s13 = smov [#allocation9]  }
   0xe   : > { %s2896_s9 = scalar_select %p2334_p1, 1, 0 }
   0xf   : > { %p2339_p3 = pnand %p1474_p0, %p229_p2  ;;  %s242_s12 = sshll.u32 %s2246_s11, 4  ;;  %s243_s12 = int_to_ptr.vmem [resolvable:$true] %s242_s12 }
  0x10   : > { %s252_s14 = sshll.u32 %s2247_s13, 4  ;;  %s2248_s16 = smov [#allocation11]   ;;  %s2351_s14 = int_to_ptr.vmem [resolvable:$true] %s252_s14 }
  0x11   : > { %s2897_s10 = scalar_select %p2339_p3, 1, 0 }
  0x12   : > { %p1916_p4 = pneg %p2339_p3  ;;  %s2353_s17 = sshll.u32 %s2248_s16, 4  ;;  %s267_s17 = int_to_ptr.vmem [resolvable:$true] %s2353_s17 }
  0x13   : > { %s2006_s20 = scalar_lea.hbm %s2885_s2, 64 }
  0x14   : > { %p2347_p5 = pnand %p1916_p4, %p2334_p1  ;;  %p2007_p6 = scmp.ne.s32.totalorder %s2885_s2, %s2006_s20 }
  0x15   : > { %p2013_p10 = scmp.lt.u32.totalorder %s2006_s20, %s2885_s2 }
  0x16   : > { %p2363_p7 = pneg %p2347_p5 }
  0x18   : > { %p2009_p8 = pnand %p2363_p7, %p2007_p6 }
  0x1a   : > { %p2010_p9 = pneg %p2009_p8 }
  0x1c   : > { %p2015_p11 = pnand %p2013_p10, %p2010_p9 }
  0x1e   : > { %2018 = shalt.err (!%p2015_p11)
}
  0x1f   : > { %s2019_s11 = scalar_lea.vmem %s243_s12, 64  ;;  %p2027_p2 = scmp.lt.s32.totalorder %s243_s12, %s243_s12 }
  0x20   : > { %p2020_p12 = scmp.ne.s32.totalorder %s243_s12, %s2019_s11  ;;  %p2028_p4 = scmp.lt.s32.totalorder %s2019_s11, %s2019_s11 }
  0x22   : > { %p2022_p13 = pnand %p2020_p12, %p2363_p7  ;;  %p2029_p3 = por %p2028_p4, %p2027_p2 }
  0x24   : > { %p2023_p0 = pneg %p2022_p13 }
  0x26   : > { %p2030_p1 = pnand %p2029_p3, %p2023_p0 }
  0x28   : > { %2033 = shalt.err (!%p2030_p1)
}
  0x29   : > { %1919 = dma.hbm_to_vmem [thread:$0]  (!%p2347_p5), %s2885_s2, 64, %s243_s12, [#allocation7]  }
  0x2a   : > { %s2034_s20 = scalar_lea.hbm %s2886_s3, 16384 }
  0x2b   : > { %p2035_p6 = scmp.ne.s32.totalorder %s2886_s3, %s2034_s20  ;;  %p2041_p1 = scmp.lt.u32.totalorder %s2034_s20, %s2886_s3 }
  0x2d   : > { %p2037_p8 = pnand %p2035_p6, %p2363_p7 }
  0x2f   : > { %p2038_p9 = pneg %p2037_p8 }
  0x31   : > { %p2043_p3 = pnand %p2041_p1, %p2038_p9 }
  0x33   : > { %2046 = shalt.err (!%p2043_p3)
}
  0x34   : > { %s2047_s12 = scalar_lea.vmem %s2351_s14, 16384  ;;  %p2055_p13 = scmp.lt.s32.totalorder %s2351_s14, %s2351_s14 }
  0x35   : > { %p2048_p10 = scmp.ne.s32.totalorder %s2351_s14, %s2047_s12  ;;  %p2056_p0 = scmp.lt.s32.totalorder %s2047_s12, %s2047_s12 }
  0x37   : > { %p2050_p11 = pnand %p2048_p10, %p2363_p7  ;;  %p2057_p2 = por %p2056_p0, %p2055_p13 }
  0x39   : > { %p2051_p12 = pneg %p2050_p11 }
  0x3b   : > { %p2058_p4 = pnand %p2057_p2, %p2051_p12 }
  0x3d   : > { %2061 = shalt.err (!%p2058_p4)
}
  0x3e   : > { %s2249_s11 = smov 256   ;;  %s2250_s13 = smov 16  }
  0x3f   : > { %1922 = dma.hbm_to_vmem [thread:$0]  (!%p2347_p5), %s2886_s3, 16384, %s2351_s14, [#allocation10], %s2249_s11, %s2249_s11, %s2250_s13  }
  0x40   : > { %s2062_s21 = scalar_lea.hbm %s2887_s4, 32 }
  0x41   : > { %p2063_p6 = scmp.ne.s32.totalorder %s2887_s4, %s2062_s21  ;;  %p2069_p1 = scmp.lt.u32.totalorder %s2062_s21, %s2887_s4 }
  0x43   : > { %p2065_p8 = pnand %p2063_p6, %p2363_p7 }
  0x45   : > { %p2066_p9 = pneg %p2065_p8 }
  0x47   : > { %p2071_p3 = pnand %p2069_p1, %p2066_p9 }
  0x49   : > { %2074 = shalt.err (!%p2071_p3)
}
  0x4a   : > { %s2075_s16 = scalar_lea.vmem %s267_s17, 32  ;;  %p2083_p13 = scmp.lt.s32.totalorder %s267_s17, %s267_s17 }
  0x4b   : > { %p2076_p10 = scmp.ne.s32.totalorder %s267_s17, %s2075_s16  ;;  %p2084_p0 = scmp.lt.s32.totalorder %s2075_s16, %s2075_s16 }
  0x4d   : > { %p2078_p11 = pnand %p2076_p10, %p2363_p7  ;;  %p2085_p2 = por %p2084_p0, %p2083_p13 }
  0x4f   : > { %p2079_p12 = pneg %p2078_p11 }
  0x51   : > { %p2086_p4 = pnand %p2085_p2, %p2079_p12 }
  0x53   : > { %2089 = shalt.err (!%p2086_p4)
}
  0x54   : > { %1925 = dma.hbm_to_vmem [thread:$0]  (!%p2347_p5), %s2887_s4, 32, %s267_s17, [#allocation10]  }
  0x55   : > { %s2251_s13 = smov [#allocation12]   ;;  %s2090_s21 = scalar_lea.hbm %s2888_s5, 32 }
  0x56   : > { %s277_s18 = sshll.u32 %s2251_s13, 4  ;;  %p2091_p6 = scmp.ne.s32.totalorder %s2888_s5, %s2090_s21  ;;  %s278_s18 = int_to_ptr.vmem [resolvable:$true] %s277_s18 }
  0x57   : > { %p2097_p1 = scmp.lt.u32.totalorder %s2090_s21, %s2888_s5 }
  0x58   : > { %p2093_p8 = pnand %p2091_p6, %p2363_p7 }
  0x5a   : > { %p2094_p9 = pneg %p2093_p8 }
  0x5c   : > { %p2099_p3 = pnand %p2097_p1, %p2094_p9 }
  0x5e   : > { %2102 = shalt.err (!%p2099_p3)
}
  0x5f   : > { %s2103_s17 = scalar_lea.vmem %s278_s18, 32  ;;  %p2111_p13 = scmp.lt.s32.totalorder %s278_s18, %s278_s18 }
  0x60   : > { %p2104_p10 = scmp.ne.s32.totalorder %s278_s18, %s2103_s17  ;;  %p2112_p0 = scmp.lt.s32.totalorder %s2103_s17, %s2103_s17 }
  0x62   : > { %p2106_p11 = pnand %p2104_p10, %p2363_p7  ;;  %p2113_p2 = por %p2112_p0, %p2111_p13 }
  0x64   : > { %p2107_p12 = pneg %p2106_p11 }
  0x66   : > { %p2114_p4 = pnand %p2113_p2, %p2107_p12 }
  0x68   : > { %2117 = shalt.err (!%p2114_p4)
}
  0x69   : > { %1928 = dma.hbm_to_vmem [thread:$0]  (!%p2347_p5), %s2888_s5, 32, %s278_s18, [#allocation13]  }
  0x6a   : > { %s36_s23 = sadd.s32 1, %s2240_s30  ;;  %s48_s11 = sadd.s32 1, %s2232_s28 }
  0x6b   : > { %p37_p7 = scmp.ge.s32.totalorder %s36_s23, 2  ;;  %p55_p6 = scmp.ne.s32.totalorder %s2232_s28, %s2228_s27 }
  0x6c   : > { %p56_p8 = scmp.eq.s32.totalorder %s2244_s8, 0  ;;  %p61_p9 = scmp.ne.s32.totalorder %s2228_s27, %s2224_s26 }
  0x6d   : > { %s2914_s23 = smov (%p37_p7, %s36_s23), 0  ;;  %p2901_p3 = scmp.ne.s32.totalorder %s2896_s9, 0 }
  0x6e   : > { %p2448_p1 = por %p56_p8, %p55_p6  ;;  %s44_s18 = ssub.s32 %s2240_s30, %s2914_s23 }
  0x6f   : > { %p2454_p10 = por %p2901_p3, %p61_p9  ;;  %p1940_p5 = scmp.lt.s32.totalorder %s2244_s8, 2 }
  0x70   : > { %p46_p11 = scmp.eq.s32.totalorder %s44_s18, 0  ;;  %s2462_s19 = sand.u32 1, %s2232_s28  }
  0x71   : > { %s1480_s26 = sshll.u32 %s2462_s19, 5  ;;  %s1501_s21 = sshll.u32 %s2240_s30, 9 }
  0x72   : > { %s2466_s20 = scalar_select %p46_p11, %s2232_s28, %s48_s11  }
  0x73   : > { %s2903_s0 = sld [smem:[#allocation19_spill]]  ;;  %s295_s12 = scalar_lea.vmem [#allocation4], %s1480_s26 }
  0x74   : > { %s305_s17 = sshll.u32 %s295_s12, 4  ;;  %p2478_p12 = pnand %p1940_p5, %p2448_p1  ;;  %s2474_s17 = int_to_ptr.vmem [resolvable:$true] %s305_s17 }
  0x75   : > { %s1483_s14 = sshll.u32 %s2462_s19, 11  ;;  %s1503_s11 = sshll.u32 %s2240_s30, 15 }
  0x76   : > { %s292_s18 = scalar_lea.sflag [#allocation5], %s2462_s19  ;;  %p2120_p0 = pneg %p2478_p12 }
  0x79   : > { %s2472_s25 = scalar_lea.hbm %s2903_s0, %s1501_s21  ;;  %s2123_s15 = scalar_lea.hbm %s2903_s0, 1024 }
  0x7a   : > { %s2118_s21 = scalar_lea.hbm %s2472_s25, 512  ;;  %p2124_p7 = scmp.lt.u32.totalorder %s2472_s25, %s2903_s0 }
  0x7b   : > { %p2119_p13 = scmp.ne.s32.totalorder %s2472_s25, %s2118_s21  ;;  %p2125_p6 = scmp.lt.u32.totalorder %s2123_s15, %s2118_s21 }
  0x7c   : > { %p2127_p9 = scmp.lt.u32.totalorder %s2118_s21, %s2472_s25 }
  0x7d   : > { %p2121_p2 = pnand %p2120_p0, %p2119_p13  ;;  %p2126_p8 = por %p2125_p6, %p2124_p7 }
  0x7f   : > { %p2122_p4 = pneg %p2121_p2  ;;  %p2128_p1 = por %p2127_p9, %p2126_p8 }
  0x81   : > { %p2129_p3 = pnand %p2128_p1, %p2122_p4 }
  0x83   : > { %2132 = shalt.err (!%p2129_p3)
}
  0x84   : > { %s2133_s6 = scalar_lea.vmem %s2474_s17, 512  ;;  %s2252_s26 = smov [#allocation4]  }
  0x85   : > { %p2134_p5 = scmp.ne.s32.totalorder %s2474_s17, %s2133_s6  ;;  %s2138_s22 = sshll.u32 %s2252_s26, 4  ;;  %s2139_s22 = int_to_ptr.vmem [resolvable:$false] %s2138_s22 }
  0x86   : > { %s2140_s24 = scalar_lea.vmem %s2139_s22, 1024  ;;  %p2141_p2 = scmp.lt.s32.totalorder %s2474_s17, %s2139_s22 }
  0x87   : > { %p2136_p11 = pnand %p2134_p5, %p2120_p0  ;;  %p2142_p7 = scmp.lt.s32.totalorder %s2140_s24, %s2133_s6 }
  0x89   : > { %p2137_p13 = pneg %p2136_p11  ;;  %p2143_p6 = por %p2142_p7, %p2141_p2 }
  0x8b   : > { %p2144_p8 = pnand %p2143_p6, %p2137_p13 }
  0x8d   : > { %2147 = shalt.err (!%p2144_p8)
}
  0x8e   : > { %1932 = dma.hbm_to_vmem [thread:$0]  (!%p2478_p12), %s2472_s25, 512, %s2474_s17, %s292_s18  }
  0x8f   : > { %s316_s21 = scalar_lea.vmem [#allocation6], %s1483_s14  ;;  %s312_s12 = sand.u32 1, %s2244_s8  }
  0x90   : > { %s324_s15 = sshll.u32 %s316_s21, 4  ;;  %s2520_s22 = scalar_lea.hbm %s2884_s1, %s1503_s11  ;;  %s2513_s15 = int_to_ptr.vmem [resolvable:$true] %s324_s15 }
  0x91   : > { %s2522_s24 = scalar_lea.sflag [#allocation7], %s312_s12  ;;  %s2148_s0 = scalar_lea.hbm %s2520_s22, 32768 }
  0x92   : > { %p2149_p4 = scmp.ne.s32.totalorder %s2520_s22, %s2148_s0  ;;  %s2153_s17 = scalar_lea.hbm %s2884_s1, 65536 }
  0x93   : > { %p2154_p3 = scmp.lt.u32.totalorder %s2520_s22, %s2884_s1  ;;  %p2155_p5 = scmp.lt.u32.totalorder %s2153_s17, %s2148_s0 }
  0x94   : > { %p2151_p9 = pnand %p2149_p4, %p2120_p0  ;;  %p2157_p13 = scmp.lt.u32.totalorder %s2148_s0, %s2520_s22 }
  0x95   : > { %p2156_p11 = por %p2155_p5, %p2154_p3 }
  0x96   : > { %p2152_p1 = pneg %p2151_p9 }
  0x97   : > { %p2158_p2 = por %p2157_p13, %p2156_p11 }
  0x99   : > { %p2159_p7 = pnand %p2158_p2, %p2152_p1 }
  0x9b   : > { %2162 = shalt.err (!%p2159_p7)
}
  0x9c   : > { %s2163_s11 = scalar_lea.vmem %s2513_s15, 32768  ;;  %s2253_s21 = smov [#allocation6]  }
  0x9d   : > { %p2164_p6 = scmp.ne.s32.totalorder %s2513_s15, %s2163_s11  ;;  %s2168_s12 = sshll.u32 %s2253_s21, 4  ;;  %s2169_s12 = int_to_ptr.vmem [resolvable:$false] %s2168_s12 }
  0x9e   : > { %s2170_s6 = scalar_lea.vmem %s2169_s12, 65536  ;;  %p2171_p9 = scmp.lt.s32.totalorder %s2513_s15, %s2169_s12 }
  0x9f   : > { %p2166_p8 = pnand %p2164_p6, %p2120_p0  ;;  %p2172_p3 = scmp.lt.s32.totalorder %s2170_s6, %s2163_s11 }
  0xa1   : > { %p2167_p4 = pneg %p2166_p8  ;;  %p2173_p5 = por %p2172_p3, %p2171_p9 }
  0xa3   : > { %p2174_p11 = pnand %p2173_p5, %p2167_p4 }
  0xa5   : > { %2177 = shalt.err (!%p2174_p11)
}
  0xa6   : > { %s2254_s0 = smov 512   ;;  %s2255_s26 = smov 32  }
  0xa7   : > { %1935 = dma.hbm_to_vmem [thread:$0]  (!%p2478_p12), %s2520_s22, 32768, %s2513_s15, %s2522_s24, %s2254_s0, %s2254_s0, %s2255_s26  }
  0xa8   : > { %p2905_p0 = scmp.ne.s32.totalorder %s2897_s10, 0 }
  0xa9   : > { %s338_s19 = sand.u32 (!%p2905_p0), 1, %s2228_s27  }
  0xaa   : > { %336 = sbr.rel (%p2905_p0) target bundleno = 988 (0x3dc), region = 48  ;;  %s1488_s25 = sshll.u32 (!%p2905_p0), %s338_s19, 5 }
  0xab   : > { %s339_s17 = scalar_lea.sflag (!%p2905_p0), [#allocation5], %s338_s19  ;;  %s2551_s14 = scalar_lea.vmem (!%p2905_p0), [#allocation4], %s1488_s25 }
  0xb1   : > { %2203 = dma.done.wait (%p2454_p10), %s339_s17, 512  }
  0xb2   : > { %2205 = vsyncadd (%p2454_p10), %s339_s17, 4294966784  ;;  %s2906_s18 = sadd.s32 4294967295, %s2244_s8   ;;  %s1489_s15 = sshll.u32 %s338_s19, 11 }
  0xb3   : > { %s347_s16 = sand.u32 1, %s2906_s18   ;;  %s2559_s10 = scalar_lea.vmem [#allocation6], %s1489_s15 }
  0xb4   : > { %s348_s22 = scalar_lea.sflag [#allocation7], %s347_s16 }
  0xb5   : > { %2207 = dma.done.wait (%p2454_p10), %s348_s22, 32768  }
  0xb6   : > { %2209 = vsyncadd (%p2454_p10), %s348_s22, 4294934528  ;;  %p2907_p12 = scmp.ne.s32.totalorder %s2896_s9, 0 }
  0xb8   : > { %2211 = dma.done.wait (%p2907_p12), [#allocation7], 64  }
  0xb9   : > { %2213 = vsyncadd (%p2907_p12), [#allocation7], 4294967232 }
  0xba   : > { %2215 = dma.done.wait (%p2907_p12), [#allocation10], 16416  }
  0xbb   : > { %2217 = vsyncadd (%p2907_p12), [#allocation10], 4294950880 }
  0xbc   : > { %2219 = dma.done.wait (%p2907_p12), [#allocation13], 32  }
  0xbd   : > { %2221 = vsyncadd (%p2907_p12), [#allocation13], 4294967264  ;;  %p1494_p10 = scmp.ne.s32.totalorder %s2236_s29, 0 }
  0xbe   : > { %v2256_v1 = vmov (!%p1494_p10), 0.0  }
  0xbf   : > { %411 = sbr.rel (%p1494_p10) target bundleno = 198 (0xc6), region = 76  ;;  %412 = vst [vmem:[#allocation2] sm:$0xff] (!%p1494_p10), %v2256_v1  ;;  %413 = vst [vmem:[#allocation2 + $0x8] sm:$0xff] (!%p1494_p10), %v2256_v1 }
  0xc0   : > { %414 = vst [vmem:[#allocation2 + $0x10] sm:$0xff] (!%p1494_p10), %v2256_v1  ;;  %415 = vst [vmem:[#allocation2 + $0x18] sm:$0xff] (!%p1494_p10), %v2256_v1 }
  0xc6 PF: > { %v425_v2 = vld [vmem:[%s2559_s10 + $0x8] sm:$0xff]  ;;  %v427_v4 = vld [vmem:[%s2559_s10 + $0x18] sm:$0xff]  ;;  %v424_v7 = vld [vmem:[%s2559_s10] sm:$0xff]  ;;  %p1495_p1 = scmp.ne.s32.totalorder %s2236_s29, 1 }
  0xc7   : > { %v429_v3 = vld [vmem:[%s2559_s10 + $0x28] sm:$0xff]  ;;  %v431_v6 = vld [vmem:[%s2559_s10 + $0x38] sm:$0xff]  ;;  %v428_v8 = vld [vmem:[%s2559_s10 + $0x20] sm:$0xff]  ;;  %vm1337_vm6 = vcmask (!%p1495_p1), 7168  }
  0xc8   : > { %v1504_v5 = vpack.c.bf16 %v429_v3, %v425_v2  ;;  %v1632_v9 = vpack.c.bf16 %v431_v6, %v427_v4  ;;  %v1506_v10 = vpack.c.bf16 %v428_v8, %v424_v7  ;;  %v426_v11 = vld [vmem:[%s2559_s10 + $0x10] sm:$0xff]  ;;  %v433_v13 = vld [vmem:[%s2559_s10 + $0x48] sm:$0xff]  ;;  %v435_v16 = vld [vmem:[%s2559_s10 + $0x58] sm:$0xff] }
  0xc9   : > { %v430_v12 = vld [vmem:[%s2559_s10 + $0x30] sm:$0xff]  ;;  %v437_v15 = vld [vmem:[%s2559_s10 + $0x68] sm:$0xff]  ;;  %v439_v17 = vld [vmem:[%s2559_s10 + $0x78] sm:$0xff] }
  0xca   : > { %1505 = vmatprep.subr.bf16.mxu0 %v1504_v5  ;;  %v1634_v14 = vpack.c.bf16 %v430_v12, %v426_v11  ;;  %1633 = vmatprep.subr.bf16.mxu1 %v1632_v9  ;;  %v1508_v18 = vpack.c.bf16 %v437_v15, %v433_v13  ;;  %v1636_v19 = vpack.c.bf16 %v439_v17, %v435_v16  ;;  %v432_v20 = vld [vmem:[%s2559_s10 + $0x40] sm:$0xff]  ;;  %v434_v22 = vld [vmem:[%s2559_s10 + $0x50] sm:$0xff]  ;;  %v441_v25 = vld [vmem:[%s2559_s10 + $0x88] sm:$0xff] }
  0xcb   : > { %1507 = vmatpush1.bf16.msra.mxu0 %v1506_v10  ;;  %v436_v21 = vld [vmem:[%s2559_s10 + $0x60] sm:$0xff]  ;;  %v438_v24 = vld [vmem:[%s2559_s10 + $0x70] sm:$0xff]  ;;  %v445_v26 = vld [vmem:[%s2559_s10 + $0xa8] sm:$0xff] }
  0xcc   : > { %1635 = vmatpush1.bf16.msra.mxu1 %v1634_v14  ;;  %v1510_v23 = vpack.c.bf16 %v436_v21, %v432_v20  ;;  %1509 = vmatprep.subr.bf16.mxu0 %v1508_v18  ;;  %v1638_v27 = vpack.c.bf16 %v438_v24, %v434_v22  ;;  %v1512_v28 = vpack.c.bf16 %v445_v26, %v441_v25  ;;  %v443_v29 = vld [vmem:[%s2559_s10 + $0x98] sm:$0xff]  ;;  %v440_v31 = vld [vmem:[%s2559_s10 + $0x80] sm:$0xff]  ;;  %v442_v34 = vld [vmem:[%s2559_s10 + $0x90] sm:$0xff] }
  0xcd   : > { %1637 = vmatprep.subr.bf16.mxu1 %v1636_v19  ;;  %v447_v30 = vld [vmem:[%s2559_s10 + $0xb8] sm:$0xff]  ;;  %v444_v33 = vld [vmem:[%s2559_s10 + $0xa0] sm:$0xff]  ;;  %v446_v35 = vld [vmem:[%s2559_s10 + $0xb0] sm:$0xff] }
  0xce   : > { %v1640_v32 = vpack.c.bf16 %v447_v30, %v443_v29  ;;  %v1514_v36 = vpack.c.bf16 %v444_v33, %v440_v31  ;;  %v449_v37 = vld [vmem:[%s2559_s10 + $0xc8] sm:$0xff]  ;;  %v451_v39 = vld [vmem:[%s2559_s10 + $0xd8] sm:$0xff]  ;;  %v1642_v40 = vpack.c.bf16 %v446_v35, %v442_v34  ;;  %v448_v43 = vld [vmem:[%s2559_s10 + $0xc0] sm:$0xff] }
  0xcf   : > { %1511 = vmatpush1.bf16.msra.mxu0 %v1510_v23  ;;  %v453_v38 = vld [vmem:[%s2559_s10 + $0xe8] sm:$0xff]  ;;  %v455_v42 = vld [vmem:[%s2559_s10 + $0xf8] sm:$0xff]  ;;  %v452_v44 = vld [vmem:[%s2559_s10 + $0xe0] sm:$0xff] }
  0xd0   : > { %1639 = vmatpush1.bf16.msra.mxu1 %v1638_v27  ;;  %1513 = vmatprep.subr.bf16.mxu0 %v1512_v28  ;;  %v1516_v41 = vpack.c.bf16 %v453_v38, %v449_v37  ;;  %v1644_v45 = vpack.c.bf16 %v455_v42, %v451_v39  ;;  %v450_v46 = vld [vmem:[%s2559_s10 + $0xd0] sm:$0xff]  ;;  %v457_v48 = vld [vmem:[%s2559_s10 + $0x108] sm:$0xff]  ;;  %v459_v50 = vld [vmem:[%s2559_s10 + $0x118] sm:$0xff]  ;;  %v1518_v52 = vpack.c.bf16 %v452_v44, %v448_v43 }
  0xd1   : > { %1641 = vmatprep.subr.bf16.mxu1 %v1640_v32  ;;  %v454_v47 = vld [vmem:[%s2559_s10 + $0xf0] sm:$0xff]  ;;  %v461_v49 = vld [vmem:[%s2559_s10 + $0x128] sm:$0xff]  ;;  %v463_v51 = vld [vmem:[%s2559_s10 + $0x138] sm:$0xff] }
  0xd2   : > { %v1646_v53 = vpack.c.bf16 %v454_v47, %v450_v46  ;;  %v1520_v54 = vpack.c.bf16 %v461_v49, %v457_v48  ;;  %v456_v55 = vld [vmem:[%s2559_s10 + $0x100] sm:$0xff]  ;;  %v458_v57 = vld [vmem:[%s2559_s10 + $0x110] sm:$0xff]  ;;  %v1648_v58 = vpack.c.bf16 %v463_v51, %v459_v50  ;;  %v465_v60 = vld [vmem:[%s2559_s10 + $0x148] sm:$0xff] }
  0xd3   : > { %1515 = vmatpush1.bf16.msra.mxu0 %v1514_v36  ;;  %v460_v56 = vld [vmem:[%s2559_s10 + $0x120] sm:$0xff]  ;;  %v462_v59 = vld [vmem:[%s2559_s10 + $0x130] sm:$0xff]  ;;  %v469_v61 = vld [vmem:[%s2559_s10 + $0x168] sm:$0xff] }
  0xd4   : > { %1643 = vmatpush1.bf16.msra.mxu1 %v1642_v40  ;;  %1517 = vmatprep.subr.bf16.mxu0 %v1516_v41  ;;  %v467_v62 = vld [vmem:[%s2559_s10 + $0x158] sm:$0xff]  ;;  %v1522_v0 = vpack.c.bf16 %v460_v56, %v456_v55  ;;  %v1650_v1 = vpack.c.bf16 %v462_v59, %v458_v57  ;;  %v1524_v2 = vpack.c.bf16 %v469_v61, %v465_v60  ;;  %v464_v3 = vld [vmem:[%s2559_s10 + $0x140] sm:$0xff]  ;;  %v466_v5 = vld [vmem:[%s2559_s10 + $0x150] sm:$0xff] }
  0xd5   : > { %1645 = vmatprep.subr.bf16.mxu1 %v1644_v45  ;;  %v471_v63 = vld [vmem:[%s2559_s10 + $0x178] sm:$0xff]  ;;  %v468_v4 = vld [vmem:[%s2559_s10 + $0x160] sm:$0xff]  ;;  %v470_v7 = vld [vmem:[%s2559_s10 + $0x170] sm:$0xff] }
  0xd6   : > { %v1652_v6 = vpack.c.bf16 %v471_v63, %v467_v62  ;;  %v473_v8 = vld [vmem:[%s2559_s10 + $0x188] sm:$0xff]  ;;  %v475_v10 = vld [vmem:[%s2559_s10 + $0x198] sm:$0xff]  ;;  %v1526_v12 = vpack.c.bf16 %v468_v4, %v464_v3  ;;  %v1654_v13 = vpack.c.bf16 %v470_v7, %v466_v5  ;;  %v472_v15 = vld [vmem:[%s2559_s10 + $0x180] sm:$0xff] }
  0xd7   : > { %1519 = vmatpush1.bf16.msra.mxu0 %v1518_v52  ;;  %v477_v9 = vld [vmem:[%s2559_s10 + $0x1a8] sm:$0xff]  ;;  %v479_v11 = vld [vmem:[%s2559_s10 + $0x1b8] sm:$0xff]  ;;  %v476_v16 = vld [vmem:[%s2559_s10 + $0x1a0] sm:$0xff] }
  0xd8   : > { %1647 = vmatpush1.bf16.msra.mxu1 %v1646_v53  ;;  %1521 = vmatprep.subr.bf16.mxu0 %v1520_v54  ;;  %v1528_v14 = vpack.c.bf16 %v477_v9, %v473_v8  ;;  %v474_v17 = vld [vmem:[%s2559_s10 + $0x190] sm:$0xff]  ;;  %v1656_v18 = vpack.c.bf16 %v479_v11, %v475_v10  ;;  %v481_v20 = vld [vmem:[%s2559_s10 + $0x1c8] sm:$0xff]  ;;  %v483_v22 = vld [vmem:[%s2559_s10 + $0x1d8] sm:$0xff]  ;;  %v1530_v24 = vpack.c.bf16 %v476_v16, %v472_v15 }
  0xd9   : > { %1649 = vmatprep.subr.bf16.mxu1 %v1648_v58  ;;  %v478_v19 = vld [vmem:[%s2559_s10 + $0x1b0] sm:$0xff]  ;;  %v485_v21 = vld [vmem:[%s2559_s10 + $0x1e8] sm:$0xff]  ;;  %v487_v23 = vld [vmem:[%s2559_s10 + $0x1f8] sm:$0xff] }
  0xda   : > { %v1658_v25 = vpack.c.bf16 %v478_v19, %v474_v17  ;;  %v1532_v26 = vpack.c.bf16 %v485_v21, %v481_v20  ;;  %v480_v27 = vld [vmem:[%s2559_s10 + $0x1c0] sm:$0xff]  ;;  %v482_v29 = vld [vmem:[%s2559_s10 + $0x1d0] sm:$0xff]  ;;  %v1660_v30 = vpack.c.bf16 %v487_v23, %v483_v22  ;;  %v489_v32 = vld [vmem:[%s2559_s10 + $0x208] sm:$0xff] }
  0xdb   : > { %1523 = vmatpush1.bf16.msra.mxu0 %v1522_v0  ;;  %v484_v28 = vld [vmem:[%s2559_s10 + $0x1e0] sm:$0xff]  ;;  %v486_v31 = vld [vmem:[%s2559_s10 + $0x1f0] sm:$0xff]  ;;  %v493_v33 = vld [vmem:[%s2559_s10 + $0x228] sm:$0xff] }
  0xdc   : > { %1651 = vmatpush1.bf16.msra.mxu1 %v1650_v1  ;;  %1525 = vmatprep.subr.bf16.mxu0 %v1524_v2  ;;  %v491_v34 = vld [vmem:[%s2559_s10 + $0x218] sm:$0xff]  ;;  %v1534_v36 = vpack.c.bf16 %v484_v28, %v480_v27  ;;  %v1662_v37 = vpack.c.bf16 %v486_v31, %v482_v29  ;;  %v1536_v38 = vpack.c.bf16 %v493_v33, %v489_v32  ;;  %v488_v39 = vld [vmem:[%s2559_s10 + $0x200] sm:$0xff]  ;;  %v490_v41 = vld [vmem:[%s2559_s10 + $0x210] sm:$0xff] }
  0xdd   : > { %1653 = vmatprep.subr.bf16.mxu1 %v1652_v6  ;;  %v495_v35 = vld [vmem:[%s2559_s10 + $0x238] sm:$0xff]  ;;  %v492_v40 = vld [vmem:[%s2559_s10 + $0x220] sm:$0xff]  ;;  %v494_v43 = vld [vmem:[%s2559_s10 + $0x230] sm:$0xff] }
  0xde   : > { %v1664_v42 = vpack.c.bf16 %v495_v35, %v491_v34  ;;  %v497_v44 = vld [vmem:[%s2559_s10 + $0x248] sm:$0xff]  ;;  %v499_v46 = vld [vmem:[%s2559_s10 + $0x258] sm:$0xff]  ;;  %v1538_v48 = vpack.c.bf16 %v492_v40, %v488_v39  ;;  %v1666_v49 = vpack.c.bf16 %v494_v43, %v490_v41  ;;  %v496_v51 = vld [vmem:[%s2559_s10 + $0x240] sm:$0xff] }
  0xdf   : > { %1527 = vmatpush1.bf16.msra.mxu0 %v1526_v12  ;;  %v501_v45 = vld [vmem:[%s2559_s10 + $0x268] sm:$0xff]  ;;  %v503_v47 = vld [vmem:[%s2559_s10 + $0x278] sm:$0xff]  ;;  %v500_v52 = vld [vmem:[%s2559_s10 + $0x260] sm:$0xff] }
  0xe0   : > { %1655 = vmatpush1.bf16.msra.mxu1 %v1654_v13  ;;  %1529 = vmatprep.subr.bf16.mxu0 %v1528_v14  ;;  %v1540_v50 = vpack.c.bf16 %v501_v45, %v497_v44  ;;  %v498_v53 = vld [vmem:[%s2559_s10 + $0x250] sm:$0xff]  ;;  %v1668_v54 = vpack.c.bf16 %v503_v47, %v499_v46  ;;  %v505_v56 = vld [vmem:[%s2559_s10 + $0x288] sm:$0xff]  ;;  %v507_v58 = vld [vmem:[%s2559_s10 + $0x298] sm:$0xff]  ;;  %v1542_v60 = vpack.c.bf16 %v500_v52, %v496_v51 }
  0xe1   : > { %1657 = vmatprep.subr.bf16.mxu1 %v1656_v18  ;;  %v502_v55 = vld [vmem:[%s2559_s10 + $0x270] sm:$0xff]  ;;  %v509_v57 = vld [vmem:[%s2559_s10 + $0x2a8] sm:$0xff]  ;;  %v511_v59 = vld [vmem:[%s2559_s10 + $0x2b8] sm:$0xff] }
  0xe2   : > { %v1670_v61 = vpack.c.bf16 %v502_v55, %v498_v53  ;;  %v1544_v62 = vpack.c.bf16 %v509_v57, %v505_v56  ;;  %v504_v63 = vld [vmem:[%s2559_s10 + $0x280] sm:$0xff]  ;;  %v506_v1 = vld [vmem:[%s2559_s10 + $0x290] sm:$0xff]  ;;  %v1672_v2 = vpack.c.bf16 %v511_v59, %v507_v58  ;;  %v513_v4 = vld [vmem:[%s2559_s10 + $0x2c8] sm:$0xff] }
  0xe3   : > { %1531 = vmatpush1.bf16.msra.mxu0 %v1530_v24  ;;  %v508_v0 = vld [vmem:[%s2559_s10 + $0x2a0] sm:$0xff]  ;;  %v510_v3 = vld [vmem:[%s2559_s10 + $0x2b0] sm:$0xff]  ;;  %v517_v5 = vld [vmem:[%s2559_s10 + $0x2e8] sm:$0xff] }
  0xe4   : > { %1659 = vmatpush1.bf16.msra.mxu1 %v1658_v25  ;;  %1533 = vmatprep.subr.bf16.mxu0 %v1532_v26  ;;  %v515_v6 = vld [vmem:[%s2559_s10 + $0x2d8] sm:$0xff]  ;;  %v1546_v8 = vpack.c.bf16 %v508_v0, %v504_v63  ;;  %v512_v9 = vld [vmem:[%s2559_s10 + $0x2c0] sm:$0xff]  ;;  %v1674_v10 = vpack.c.bf16 %v510_v3, %v506_v1  ;;  %v1548_v11 = vpack.c.bf16 %v517_v5, %v513_v4  ;;  %v514_v13 = vld [vmem:[%s2559_s10 + $0x2d0] sm:$0xff] }
  0xe5   : > { %1661 = vmatprep.subr.bf16.mxu1 %v1660_v30  ;;  %v519_v7 = vld [vmem:[%s2559_s10 + $0x2f8] sm:$0xff]  ;;  %v516_v12 = vld [vmem:[%s2559_s10 + $0x2e0] sm:$0xff]  ;;  %v518_v14 = vld [vmem:[%s2559_s10 + $0x2f0] sm:$0xff] }
  0xe6   : > { %v1676_v15 = vpack.c.bf16 %v519_v7, %v515_v6  ;;  %v521_v16 = vld [vmem:[%s2559_s10 + $0x308] sm:$0xff]  ;;  %v523_v19 = vld [vmem:[%s2559_s10 + $0x318] sm:$0xff]  ;;  %v1550_v21 = vpack.c.bf16 %v516_v12, %v512_v9  ;;  %v1678_v22 = vpack.c.bf16 %v518_v14, %v514_v13  ;;  %v520_v24 = vld [vmem:[%s2559_s10 + $0x300] sm:$0xff] }
  0xe7   : > { %1535 = vmatpush1.bf16.msra.mxu0 %v1534_v36  ;;  %v525_v17 = vld [vmem:[%s2559_s10 + $0x328] sm:$0xff]  ;;  %v527_v20 = vld [vmem:[%s2559_s10 + $0x338] sm:$0xff]  ;;  %v524_v25 = vld [vmem:[%s2559_s10 + $0x320] sm:$0xff] }
  0xe8   : > { %1663 = vmatpush1.bf16.msra.mxu1 %v1662_v37  ;;  %1537 = vmatprep.subr.bf16.mxu0 %v1536_v38  ;;  %v421_v18 = vld [vmem:[%s2551_s14 + $0x8] sm:$0xff]  ;;  %v1552_v23 = vpack.c.bf16 %v525_v17, %v521_v16  ;;  %v522_v26 = vld [vmem:[%s2559_s10 + $0x310] sm:$0xff]  ;;  %v1680_v27 = vpack.c.bf16 %v527_v20, %v523_v19  ;;  %v531_v31 = vld [vmem:[%s2559_s10 + $0x358] sm:$0xff]  ;;  %v1554_v33 = vpack.c.bf16 %v524_v25, %v520_v24 }
  0xe9   : > { %1665 = vmatprep.subr.bf16.mxu1 %v1664_v42  ;;  %744 = vmatprep.mubr.f32.mxu0 %v421_v18  ;;  %v526_v28 = vld [vmem:[%s2559_s10 + $0x330] sm:$0xff]  ;;  %v529_v29 = vld [vmem:[%s2559_s10 + $0x348] sm:$0xff]  ;;  %v535_v32 = vld [vmem:[%s2559_s10 + $0x378] sm:$0xff] }
  0xea   : > { %886 = vmatprep.mubr.f32.mxu1 %v421_v18  ;;  %v533_v30 = vld [vmem:[%s2559_s10 + $0x368] sm:$0xff]  ;;  %v1682_v34 = vpack.c.bf16 %v526_v28, %v522_v26  ;;  %v528_v36 = vld [vmem:[%s2559_s10 + $0x340] sm:$0xff]  ;;  %v530_v38 = vld [vmem:[%s2559_s10 + $0x350] sm:$0xff]  ;;  %v1684_v39 = vpack.c.bf16 %v535_v32, %v531_v31 }
  0xeb   : > { %1539 = vmatpush1.bf16.msra.mxu0 %v1538_v48  ;;  %v1556_v35 = vpack.c.bf16 %v533_v30, %v529_v29  ;;  %v532_v37 = vld [vmem:[%s2559_s10 + $0x360] sm:$0xff]  ;;  %v534_v40 = vld [vmem:[%s2559_s10 + $0x370] sm:$0xff]  ;;  %v537_v41 = vld [vmem:[%s2559_s10 + $0x388] sm:$0xff] }
  0xec   : > { %1667 = vmatpush1.bf16.msra.mxu1 %v1666_v49  ;;  %1541 = vmatprep.subr.bf16.mxu0 %v1540_v50  ;;  %v541_v42 = vld [vmem:[%s2559_s10 + $0x3a8] sm:$0xff]  ;;  %v539_v43 = vld [vmem:[%s2559_s10 + $0x398] sm:$0xff]  ;;  %v1558_v45 = vpack.c.bf16 %v532_v37, %v528_v36  ;;  %v1686_v46 = vpack.c.bf16 %v534_v40, %v530_v38  ;;  %v536_v48 = vld [vmem:[%s2559_s10 + $0x380] sm:$0xff] }
  0xed   : > { %1669 = vmatprep.subr.bf16.mxu1 %v1668_v54  ;;  %v543_v44 = vld [vmem:[%s2559_s10 + $0x3b8] sm:$0xff]  ;;  %v1560_v47 = vpack.c.bf16 %v541_v42, %v537_v41  ;;  %v540_v49 = vld [vmem:[%s2559_s10 + $0x3a0] sm:$0xff]  ;;  %v538_v50 = vld [vmem:[%s2559_s10 + $0x390] sm:$0xff] }
  0xee   : > { %v1688_v51 = vpack.c.bf16 %v543_v44, %v539_v43  ;;  %v542_v52 = vld [vmem:[%s2559_s10 + $0x3b0] sm:$0xff]  ;;  %v545_v53 = vld [vmem:[%s2559_s10 + $0x3c8] sm:$0xff]  ;;  %v547_v55 = vld [vmem:[%s2559_s10 + $0x3d8] sm:$0xff]  ;;  %v1562_v57 = vpack.c.bf16 %v540_v49, %v536_v48 }
  0xef   : > { %1543 = vmatpush1.bf16.msra.mxu0 %v1542_v60  ;;  %v549_v54 = vld [vmem:[%s2559_s10 + $0x3e8] sm:$0xff]  ;;  %v551_v56 = vld [vmem:[%s2559_s10 + $0x3f8] sm:$0xff]  ;;  %v1690_v58 = vpack.c.bf16 %v542_v52, %v538_v50  ;;  %v544_v60 = vld [vmem:[%s2559_s10 + $0x3c0] sm:$0xff] }
  0xf0   : > { %1671 = vmatpush1.bf16.msra.mxu1 %v1670_v61  ;;  %1545 = vmatprep.subr.bf16.mxu0 %v1544_v62  ;;  %v1564_v59 = vpack.c.bf16 %v549_v54, %v545_v53  ;;  %v548_v61 = vld [vmem:[%s2559_s10 + $0x3e0] sm:$0xff]  ;;  %v546_v62 = vld [vmem:[%s2559_s10 + $0x3d0] sm:$0xff]  ;;  %v1692_v63 = vpack.c.bf16 %v551_v56, %v547_v55  ;;  %v553_v1 = vld [vmem:[%s2559_s10 + $0x408] sm:$0xff] }
  0xf1   : > { %1673 = vmatprep.subr.bf16.mxu1 %v1672_v2  ;;  %v550_v0 = vld [vmem:[%s2559_s10 + $0x3f0] sm:$0xff]  ;;  %v557_v2 = vld [vmem:[%s2559_s10 + $0x428] sm:$0xff]  ;;  %v555_v3 = vld [vmem:[%s2559_s10 + $0x418] sm:$0xff]  ;;  %v1566_v5 = vpack.c.bf16 %v548_v61, %v544_v60 }
  0xf2   : > { %v559_v4 = vld [vmem:[%s2559_s10 + $0x438] sm:$0xff]  ;;  %v1694_v6 = vpack.c.bf16 %v550_v0, %v546_v62  ;;  %v1568_v7 = vpack.c.bf16 %v557_v2, %v553_v1  ;;  %v556_v9 = vld [vmem:[%s2559_s10 + $0x420] sm:$0xff]  ;;  %v558_v12 = vld [vmem:[%s2559_s10 + $0x430] sm:$0xff] }
  0xf3   : > { %1547 = vmatpush1.bf16.msra.mxu0 %v1546_v8  ;;  %v552_v8 = vld [vmem:[%s2559_s10 + $0x400] sm:$0xff]  ;;  %v561_v13 = vld [vmem:[%s2559_s10 + $0x448] sm:$0xff]  ;;  %v567_v16 = vld [vmem:[%s2559_s10 + $0x478] sm:$0xff] }
  0xf4   : > { %1675 = vmatpush1.bf16.msra.mxu1 %v1674_v10  ;;  %1549 = vmatprep.subr.bf16.mxu0 %v1548_v11  ;;  %v554_v10 = vld [vmem:[%s2559_s10 + $0x410] sm:$0xff]  ;;  %v1696_v11 = vpack.c.bf16 %v559_v4, %v555_v3  ;;  %v565_v14 = vld [vmem:[%s2559_s10 + $0x468] sm:$0xff]  ;;  %v420_v17 = vld [vmem:[%s2551_s14] sm:$0xff]  ;;  %v1570_v18 = vpack.c.bf16 %v556_v9, %v552_v8 }
  0xf5   : > { %1677 = vmatprep.subr.bf16.mxu1 %v1676_v15  ;;  %v563_v15 = vld [vmem:[%s2559_s10 + $0x458] sm:$0xff]  ;;  %v1698_v19 = vpack.c.bf16 %v558_v12, %v554_v10  ;;  %v1572_v20 = vpack.c.bf16 %v565_v14, %v561_v13  ;;  %v566_v25 = vld [vmem:[%s2559_s10 + $0x470] sm:$0xff]  ;;  %v569_v26 = vld [vmem:[%s2559_s10 + $0x488] sm:$0xff] }
  0xf6   : > { %v1700_v24 = vpack.c.bf16 %v567_v16, %v563_v15  ;;  %v571_v28 = vld [vmem:[%s2559_s10 + $0x498] sm:$0xff]  ;;  %v574_v37 = vld [vmem:[%s2559_s10 + $0x4b0] sm:$0xff]  ;;  %v577_v38 = vld [vmem:[%s2559_s10 + $0x4c8] sm:$0xff] }
  0xf7   : > { %1551 = vmatpush1.bf16.msra.mxu0 %v1550_v21  ;;  %v560_v21 = vld [vmem:[%s2559_s10 + $0x440] sm:$0xff]  ;;  %v575_v29 = vld [vmem:[%s2559_s10 + $0x4b8] sm:$0xff]  ;;  %v582_v49 = vld [vmem:[%s2559_s10 + $0x4f0] sm:$0xff] }
  0xf8   : > { %1679 = vmatpush1.bf16.msra.mxu1 %v1678_v22  ;;  %1553 = vmatprep.subr.bf16.mxu0 %v1552_v23  ;;  %v564_v22 = vld [vmem:[%s2559_s10 + $0x460] sm:$0xff]  ;;  %v562_v23 = vld [vmem:[%s2559_s10 + $0x450] sm:$0xff]  ;;  %v1704_v36 = vpack.c.bf16 %v575_v29, %v571_v28  ;;  %v579_v40 = vld [vmem:[%s2559_s10 + $0x4d8] sm:$0xff] }
  0xf9   : > { %1681 = vmatprep.subr.bf16.mxu1 %v1680_v27  ;;  %v573_v27 = vld [vmem:[%s2559_s10 + $0x4a8] sm:$0xff]  ;;  %v1574_v30 = vpack.c.bf16 %v564_v22, %v560_v21  ;;  %v1702_v31 = vpack.c.bf16 %v566_v25, %v562_v23  ;;  %v583_v41 = vld [vmem:[%s2559_s10 + $0x4f8] sm:$0xff]  ;;  %v590_v61 = vld [vmem:[%s2559_s10 + $0x530] sm:$0xff] }
  0xfa   : > { %v1576_v32 = vpack.c.bf16 %v573_v27, %v569_v26  ;;  %v1708_v48 = vpack.c.bf16 %v583_v41, %v579_v40  ;;  %v585_v50 = vld [vmem:[%s2559_s10 + $0x508] sm:$0xff]  ;;  %v587_v52 = vld [vmem:[%s2559_s10 + $0x518] sm:$0xff]  ;;  %v598_v9 = vld [vmem:[%s2559_s10 + $0x570] sm:$0xff] }
  0xfb   : > { %1555 = vmatpush1.bf16.msra.mxu0 %v1554_v33  ;;  %v568_v33 = vld [vmem:[%s2559_s10 + $0x480] sm:$0xff]  ;;  %v591_v53 = vld [vmem:[%s2559_s10 + $0x538] sm:$0xff]  ;;  %v593_v62 = vld [vmem:[%s2559_s10 + $0x548] sm:$0xff] }
  0xfc   : > { %1683 = vmatpush1.bf16.msra.mxu1 %v1682_v34  ;;  %1557 = vmatprep.subr.bf16.mxu0 %v1556_v35  ;;  %v572_v34 = vld [vmem:[%s2559_s10 + $0x4a0] sm:$0xff]  ;;  %v570_v35 = vld [vmem:[%s2559_s10 + $0x490] sm:$0xff]  ;;  %v1712_v60 = vpack.c.bf16 %v591_v53, %v587_v52  ;;  %v595_v0 = vld [vmem:[%s2559_s10 + $0x558] sm:$0xff] }
  0xfd   : > { %1685 = vmatprep.subr.bf16.mxu1 %v1684_v39  ;;  %v581_v39 = vld [vmem:[%s2559_s10 + $0x4e8] sm:$0xff]  ;;  %v1578_v42 = vpack.c.bf16 %v572_v34, %v568_v33  ;;  %v1706_v43 = vpack.c.bf16 %v574_v37, %v570_v35  ;;  %v599_v1 = vld [vmem:[%s2559_s10 + $0x578] sm:$0xff]  ;;  %v600_v15 = vld [vmem:[%s2559_s10 + $0x580] sm:$0xff] }
  0xfe   : > { %v1580_v44 = vpack.c.bf16 %v581_v39, %v577_v38  ;;  %v1716_v8 = vpack.c.bf16 %v599_v1, %v595_v0  ;;  %v601_v10 = vld [vmem:[%s2559_s10 + $0x588] sm:$0xff]  ;;  %v603_v12 = vld [vmem:[%s2559_s10 + $0x598] sm:$0xff]  ;;  %v614_v34 = vld [vmem:[%s2559_s10 + $0x5f0] sm:$0xff] }
  0xff   : > { %1559 = vmatpush1.bf16.msra.mxu0 %v1558_v45  ;;  %v576_v45 = vld [vmem:[%s2559_s10 + $0x4c0] sm:$0xff]  ;;  %v607_v13 = vld [vmem:[%s2559_s10 + $0x5b8] sm:$0xff]  ;;  %v609_v22 = vld [vmem:[%s2559_s10 + $0x5c8] sm:$0xff] }
 0x100   : > { %1687 = vmatpush1.bf16.msra.mxu1 %v1686_v46  ;;  %1561 = vmatprep.subr.bf16.mxu0 %v1560_v47  ;;  %v580_v46 = vld [vmem:[%s2559_s10 + $0x4e0] sm:$0xff]  ;;  %v578_v47 = vld [vmem:[%s2559_s10 + $0x4d0] sm:$0xff]  ;;  %v1720_v21 = vpack.c.bf16 %v607_v13, %v603_v12  ;;  %v613_v23 = vld [vmem:[%s2559_s10 + $0x5e8] sm:$0xff] }
 0x101   : > { %1689 = vmatprep.subr.bf16.mxu1 %v1688_v51  ;;  %v589_v51 = vld [vmem:[%s2559_s10 + $0x528] sm:$0xff]  ;;  %v1582_v54 = vpack.c.bf16 %v580_v46, %v576_v45  ;;  %v1710_v55 = vpack.c.bf16 %v582_v49, %v578_v47  ;;  %v611_v25 = vld [vmem:[%s2559_s10 + $0x5d8] sm:$0xff]  ;;  %v1596_v29 = vpack.c.bf16 %v613_v23, %v609_v22  ;;  %v622_v46 = vld [vmem:[%s2559_s10 + $0x630] sm:$0xff] }
 0x102   : > { %v1584_v56 = vpack.c.bf16 %v589_v51, %v585_v50  ;;  %v615_v26 = vld [vmem:[%s2559_s10 + $0x5f8] sm:$0xff]  ;;  %v617_v35 = vld [vmem:[%s2559_s10 + $0x608] sm:$0xff] }
 0x103   : > { %1563 = vmatpush1.bf16.msra.mxu0 %v1562_v57  ;;  %v584_v57 = vld [vmem:[%s2559_s10 + $0x500] sm:$0xff]  ;;  %v1724_v33 = vpack.c.bf16 %v615_v26, %v611_v25  ;;  %v619_v37 = vld [vmem:[%s2559_s10 + $0x618] sm:$0xff]  ;;  %v625_v47 = vld [vmem:[%s2559_s10 + $0x648] sm:$0xff] }
 0x104   : > { %1691 = vmatpush1.bf16.msra.mxu1 %v1690_v58  ;;  %1565 = vmatprep.subr.bf16.mxu0 %v1564_v59  ;;  %v588_v58 = vld [vmem:[%s2559_s10 + $0x520] sm:$0xff]  ;;  %v586_v59 = vld [vmem:[%s2559_s10 + $0x510] sm:$0xff]  ;;  %v623_v38 = vld [vmem:[%s2559_s10 + $0x638] sm:$0xff] }
 0x105   : > { %1693 = vmatprep.subr.bf16.mxu1 %v1692_v63  ;;  %v597_v63 = vld [vmem:[%s2559_s10 + $0x568] sm:$0xff]  ;;  %v1586_v2 = vpack.c.bf16 %v588_v58, %v584_v57  ;;  %v1714_v3 = vpack.c.bf16 %v590_v61, %v586_v59  ;;  %v1728_v45 = vpack.c.bf16 %v623_v38, %v619_v37  ;;  %v627_v49 = vld [vmem:[%s2559_s10 + $0x658] sm:$0xff]  ;;  %v630_v58 = vld [vmem:[%s2559_s10 + $0x670] sm:$0xff] }
 0x106   : > { %v1588_v4 = vpack.c.bf16 %v597_v63, %v593_v62  ;;  %v631_v50 = vld [vmem:[%s2559_s10 + $0x678] sm:$0xff]  ;;  %v633_v59 = vld [vmem:[%s2559_s10 + $0x688] sm:$0xff]  ;;  %v648_v26 = vld [vmem:[%s2559_s10 + $0x700] sm:$0xff] }
 0x107   : > { %1567 = vmatpush1.bf16.msra.mxu0 %v1566_v5  ;;  %v592_v5 = vld [vmem:[%s2559_s10 + $0x540] sm:$0xff]  ;;  %v1732_v57 = vpack.c.bf16 %v631_v50, %v627_v49  ;;  %v635_v61 = vld [vmem:[%s2559_s10 + $0x698] sm:$0xff] }
 0x108   : > { %1695 = vmatpush1.bf16.msra.mxu1 %v1694_v6  ;;  %1569 = vmatprep.subr.bf16.mxu0 %v1568_v7  ;;  %v596_v6 = vld [vmem:[%s2559_s10 + $0x560] sm:$0xff]  ;;  %v594_v7 = vld [vmem:[%s2559_s10 + $0x550] sm:$0xff]  ;;  %v639_v62 = vld [vmem:[%s2559_s10 + $0x6b8] sm:$0xff] }
 0x109   : > { %1697 = vmatprep.subr.bf16.mxu1 %v1696_v11  ;;  %v605_v11 = vld [vmem:[%s2559_s10 + $0x5a8] sm:$0xff]  ;;  %v1590_v14 = vpack.c.bf16 %v596_v6, %v592_v5  ;;  %v1718_v16 = vpack.c.bf16 %v598_v9, %v594_v7  ;;  %v1736_v5 = vpack.c.bf16 %v639_v62, %v635_v61  ;;  %v638_v6 = vld [vmem:[%s2559_s10 + $0x6b0] sm:$0xff]  ;;  %v643_v9 = vld [vmem:[%s2559_s10 + $0x6d8] sm:$0xff] }
 0x10a   : > { %745 = vmatmul.mubr.f32.vlgmr.msra.gmra.mrb[0].mxu0 %v420_v17  ;;  %v641_v7 = vld [vmem:[%s2559_s10 + $0x6c8] sm:$0xff]  ;;  %v655_v22 = vld [vmem:[%s2559_s10 + $0x738] sm:$0xff]  ;;  %v656_v38 = vld [vmem:[%s2559_s10 + $0x740] sm:$0xff] }
 0x10b   : > { %1571 = vmatpush1.bf16.msra.mxu0 %v1570_v18  ;;  %887 = vmatmul.mubr.f32.vlgmr.msra.gmra.mrb[0].mxu1 %v420_v17  ;;  %v1592_v17 = vpack.c.bf16 %v605_v11, %v601_v10  ;;  %v604_v18 = vld [vmem:[%s2559_s10 + $0x5a0] sm:$0xff]  ;;  %v647_v10 = vld [vmem:[%s2559_s10 + $0x6f8] sm:$0xff] }
 0x10c   : > { %1699 = vmatpush1.bf16.msra.mxu1 %v1698_v19  ;;  %1573 = vmatprep.subr.bf16.mxu0 %v1572_v20  ;;  %v602_v19 = vld [vmem:[%s2559_s10 + $0x590] sm:$0xff]  ;;  %v1594_v27 = vpack.c.bf16 %v604_v18, %v600_v15  ;;  %v644_v15 = vld [vmem:[%s2559_s10 + $0x6e0] sm:$0xff] }
 0x10d   : > { %1701 = vmatprep.subr.bf16.mxu1 %v1700_v24  ;;  %v606_v20 = vld [vmem:[%s2559_s10 + $0x5b0] sm:$0xff]  ;;  %v423_v24 = vld [vmem:[%s2551_s14 + $0x18] sm:$0xff]  ;;  %v664_v50 = vld [vmem:[%s2559_s10 + $0x780] sm:$0xff] }
 0x10e   : > { %815 = vmatprep.mubr.f32.mxu0 %v423_v24  ;;  %957 = vmatprep.mubr.f32.mxu1 %v423_v24  ;;  %v1722_v28 = vpack.c.bf16 %v606_v20, %v602_v19  ;;  %v646_v18 = vld [vmem:[%s2559_s10 + $0x6f0] sm:$0xff]  ;;  %v649_v19 = vld [vmem:[%s2559_s10 + $0x708] sm:$0xff]  ;;  %v672_v62 = vld [vmem:[%s2559_s10 + $0x7c0] sm:$0xff] }
 0x10f   : > { %1575 = vmatpush1.bf16.msra.mxu0 %v1574_v30  ;;  %v608_v30 = vld [vmem:[%s2559_s10 + $0x5c0] sm:$0xff]  ;;  %v653_v20 = vld [vmem:[%s2559_s10 + $0x728] sm:$0xff] }
 0x110   : > { %1703 = vmatpush1.bf16.msra.mxu1 %v1702_v31  ;;  %1577 = vmatprep.subr.bf16.mxu0 %v1576_v32  ;;  %v612_v31 = vld [vmem:[%s2559_s10 + $0x5e0] sm:$0xff]  ;;  %v610_v32 = vld [vmem:[%s2559_s10 + $0x5d0] sm:$0xff]  ;;  %v1616_v25 = vpack.c.bf16 %v653_v20, %v649_v19 }
 0x111   : > { %1705 = vmatprep.subr.bf16.mxu1 %v1704_v36  ;;  %v621_v36 = vld [vmem:[%s2559_s10 + $0x628] sm:$0xff]  ;;  %v1598_v39 = vpack.c.bf16 %v612_v31, %v608_v30  ;;  %v1726_v40 = vpack.c.bf16 %v614_v34, %v610_v32  ;;  %v654_v30 = vld [vmem:[%s2559_s10 + $0x730] sm:$0xff]  ;;  %v663_v34 = vld [vmem:[%s2559_s10 + $0x778] sm:$0xff] }
 0x112   : > { %v1600_v41 = vpack.c.bf16 %v621_v36, %v617_v35  ;;  %v657_v31 = vld [vmem:[%s2559_s10 + $0x748] sm:$0xff]  ;;  %v1021_v19 = vld [vmem:[#allocation9 + $0x18] sm:$0xff] (!%p1495_p1) }
 0x113   : > { %1579 = vmatpush1.bf16.msra.mxu0 %v1578_v42  ;;  %v616_v42 = vld [vmem:[%s2559_s10 + $0x600] sm:$0xff]  ;;  %v661_v32 = vld [vmem:[%s2559_s10 + $0x768] sm:$0xff] }
 0x114   : > { %1707 = vmatpush1.bf16.msra.mxu1 %v1706_v43  ;;  %1581 = vmatprep.subr.bf16.mxu0 %v1580_v44  ;;  %v620_v43 = vld [vmem:[%s2559_s10 + $0x620] sm:$0xff]  ;;  %v618_v44 = vld [vmem:[%s2559_s10 + $0x610] sm:$0xff]  ;;  %v1620_v37 = vpack.c.bf16 %v661_v32, %v657_v31 }
 0x115   : > { %1709 = vmatprep.subr.bf16.mxu1 %v1708_v48  ;;  %v629_v48 = vld [vmem:[%s2559_s10 + $0x668] sm:$0xff]  ;;  %v1602_v51 = vpack.c.bf16 %v620_v43, %v616_v42  ;;  %v1730_v52 = vpack.c.bf16 %v622_v46, %v618_v44  ;;  %v662_v42 = vld [vmem:[%s2559_s10 + $0x770] sm:$0xff]  ;;  %v671_v46 = vld [vmem:[%s2559_s10 + $0x7b8] sm:$0xff] }
 0x116   : > { %v1604_v53 = vpack.c.bf16 %v629_v48, %v625_v47  ;;  %v665_v43 = vld [vmem:[%s2559_s10 + $0x788] sm:$0xff]  ;;  %v1025_v31 = vld [vmem:[#allocation9 + $0x38] sm:$0xff] (!%p1495_p1) }
 0x117   : > { %1583 = vmatpush1.bf16.msra.mxu0 %v1582_v54  ;;  %v624_v54 = vld [vmem:[%s2559_s10 + $0x640] sm:$0xff]  ;;  %v669_v44 = vld [vmem:[%s2559_s10 + $0x7a8] sm:$0xff] }
 0x118   : > { %1711 = vmatpush1.bf16.msra.mxu1 %v1710_v55  ;;  %1585 = vmatprep.subr.bf16.mxu0 %v1584_v56  ;;  %v628_v55 = vld [vmem:[%s2559_s10 + $0x660] sm:$0xff]  ;;  %v626_v56 = vld [vmem:[%s2559_s10 + $0x650] sm:$0xff]  ;;  %v1624_v49 = vpack.c.bf16 %v669_v44, %v665_v43 }
 0x119   : > { %1713 = vmatprep.subr.bf16.mxu1 %v1712_v60  ;;  %v637_v60 = vld [vmem:[%s2559_s10 + $0x6a8] sm:$0xff]  ;;  %v1606_v63 = vpack.c.bf16 %v628_v55, %v624_v54  ;;  %v1734_v0 = vpack.c.bf16 %v630_v58, %v626_v56  ;;  %v670_v54 = vld [vmem:[%s2559_s10 + $0x7b0] sm:$0xff]  ;;  %v679_v58 = vld [vmem:[%s2559_s10 + $0x7f8] sm:$0xff] }
 0x11a   : > { %v1608_v1 = vpack.c.bf16 %v637_v60, %v633_v59  ;;  %v673_v55 = vld [vmem:[%s2559_s10 + $0x7c8] sm:$0xff] }
 0x11b   : > { %1587 = vmatpush1.bf16.msra.mxu0 %v1586_v2  ;;  %v632_v2 = vld [vmem:[%s2559_s10 + $0x680] sm:$0xff]  ;;  %v677_v56 = vld [vmem:[%s2559_s10 + $0x7e8] sm:$0xff] }
 0x11c   : > { %1715 = vmatpush1.bf16.msra.mxu1 %v1714_v3  ;;  %1589 = vmatprep.subr.bf16.mxu0 %v1588_v4  ;;  %v636_v3 = vld [vmem:[%s2559_s10 + $0x6a0] sm:$0xff]  ;;  %v634_v4 = vld [vmem:[%s2559_s10 + $0x690] sm:$0xff]  ;;  %v1628_v61 = vpack.c.bf16 %v677_v56, %v673_v55 }
 0x11d   : > { %1717 = vmatprep.subr.bf16.mxu1 %v1716_v8  ;;  %v645_v8 = vld [vmem:[%s2559_s10 + $0x6e8] sm:$0xff]  ;;  %v1610_v11 = vpack.c.bf16 %v636_v3, %v632_v2  ;;  %v1738_v12 = vpack.c.bf16 %v638_v6, %v634_v4  ;;  %v678_v2 = vld [vmem:[%s2559_s10 + $0x7f0] sm:$0xff]  ;;  %v416_v6 = vld [vmem:[#allocation2] sm:$0xff] }
 0x11e   : > { %v1612_v13 = vpack.c.bf16 %v645_v8, %v641_v7  ;;  %v418_v7 = vld [vmem:[#allocation2 + $0x10] sm:$0xff]  ;;  %v417_v8 = vld [vmem:[#allocation2 + $0x8] sm:$0xff] }
 0x11f   : > { %1591 = vmatpush1.bf16.msra.mxu0 %v1590_v14  ;;  %v640_v14 = vld [vmem:[%s2559_s10 + $0x6c0] sm:$0xff] }
 0x120   : > { %1719 = vmatpush1.bf16.msra.mxu1 %v1718_v16  ;;  %1593 = vmatprep.subr.bf16.mxu0 %v1592_v17  ;;  %v642_v16 = vld [vmem:[%s2559_s10 + $0x6d0] sm:$0xff]  ;;  %v1740_v17 = vpack.c.bf16 %v647_v10, %v643_v9  ;;  %v1614_v23 = vpack.c.bf16 %v644_v15, %v640_v14  ;;  %v1018_v20 = vld [vmem:[#allocation9] sm:$0xff] (!%p1495_p1) }
 0x121   : > { %1721 = vmatprep.subr.bf16.mxu1 %v1720_v21  ;;  %v651_v21 = vld [vmem:[%s2559_s10 + $0x718] sm:$0xff]  ;;  %v1742_v24 = vpack.c.bf16 %v646_v18, %v642_v16  ;;  %v1019_v18 = vld [vmem:[#allocation9 + $0x8] sm:$0xff] (!%p1495_p1)  ;;  %v1022_v32 = vld [vmem:[#allocation9 + $0x20] sm:$0xff] (!%p1495_p1) }
 0x122   : > { %v419_v10 = vld [vmem:[#allocation2 + $0x18] sm:$0xff]  ;;  %v1030_v55 = vld [vmem:[#allocation9 + $0x60] sm:$0xff] (!%p1495_p1) }
 0x123   : > { %1595 = vmatpush1.bf16.msra.mxu0 %v1594_v27  ;;  %v652_v27 = vld [vmem:[%s2559_s10 + $0x720] sm:$0xff] }
 0x124   : > { %1723 = vmatpush1.bf16.msra.mxu1 %v1722_v28  ;;  %1597 = vmatprep.subr.bf16.mxu0 %v1596_v29  ;;  %v650_v28 = vld [vmem:[%s2559_s10 + $0x710] sm:$0xff]  ;;  %v1744_v29 = vpack.c.bf16 %v655_v22, %v651_v21  ;;  %v1618_v35 = vpack.c.bf16 %v652_v27, %v648_v26  ;;  %v1760_v21 = vpack.c.bf16 (!%p1495_p1), %v1021_v19, %v1019_v18  ;;  %v1082_v27 = vld [vmem:[#allocation9 + $0x200] sm:$0xff] (!%p1495_p1) }
 0x125   : > { %1725 = vmatprep.subr.bf16.mxu1 %v1724_v33  ;;  %v659_v33 = vld [vmem:[%s2559_s10 + $0x758] sm:$0xff]  ;;  %v1746_v36 = vpack.c.bf16 %v654_v30, %v650_v28  ;;  %v1038_v19 = vld [vmem:[#allocation9 + $0xa0] sm:$0xff] (!%p1495_p1) }
 0x126   : > { %v1020_v22 = vld [vmem:[#allocation9 + $0x10] sm:$0xff] (!%p1495_p1) }
 0x127   : > { %1599 = vmatpush1.bf16.msra.mxu0 %v1598_v39  ;;  %v660_v39 = vld [vmem:[%s2559_s10 + $0x760] sm:$0xff]  ;;  %v1084_v28 = vld [vmem:[#allocation9 + $0x210] sm:$0xff] (!%p1495_p1) }
 0x128   : > { %1727 = vmatpush1.bf16.msra.mxu1 %v1726_v40  ;;  %1601 = vmatprep.subr.bf16.mxu0 %v1600_v41  ;;  %v658_v40 = vld [vmem:[%s2559_s10 + $0x750] sm:$0xff]  ;;  %v1748_v41 = vpack.c.bf16 %v663_v34, %v659_v33  ;;  %v1622_v47 = vpack.c.bf16 %v660_v39, %v656_v38  ;;  %v1826_v30 = vpack.c.bf16 (!%p1495_p1), %v1084_v28, %v1082_v27  ;;  %v1086_v38 = vld [vmem:[#allocation9 + $0x220] sm:$0xff] (!%p1495_p1)  ;;  %v1109_v27 = vld [vmem:[#allocation9 + $0x2d8] sm:$0xff] (!%p1495_p1) }
 0x129   : > { %1729 = vmatprep.subr.bf16.mxu1 %v1728_v45  ;;  %v667_v45 = vld [vmem:[%s2559_s10 + $0x798] sm:$0xff]  ;;  %v1750_v48 = vpack.c.bf16 %v662_v42, %v658_v40 }
 0x12a   : > { %v1024_v33 = vld [vmem:[#allocation9 + $0x30] sm:$0xff] (!%p1495_p1)  ;;  %v1029_v42 = vld [vmem:[#allocation9 + $0x58] sm:$0xff] (!%p1495_p1) }
 0x12b   : > { %1603 = vmatpush1.bf16.msra.mxu0 %v1602_v51  ;;  %v668_v51 = vld [vmem:[%s2559_s10 + $0x7a0] sm:$0xff]  ;;  %v1088_v40 = vld [vmem:[#allocation9 + $0x230] sm:$0xff] (!%p1495_p1) }
 0x12c   : > { %1731 = vmatpush1.bf16.msra.mxu1 %v1730_v52  ;;  %1605 = vmatprep.subr.bf16.mxu0 %v1604_v53  ;;  %v666_v52 = vld [vmem:[%s2559_s10 + $0x790] sm:$0xff]  ;;  %v1752_v53 = vpack.c.bf16 %v671_v46, %v667_v45  ;;  %v1626_v59 = vpack.c.bf16 %v668_v51, %v664_v50  ;;  %v1830_v43 = vpack.c.bf16 (!%p1495_p1), %v1088_v40, %v1086_v38  ;;  %v1026_v45 = vld [vmem:[#allocation9 + $0x40] sm:$0xff] (!%p1495_p1) }
 0x12d   : > { %1733 = vmatprep.subr.bf16.mxu1 %v1732_v57  ;;  %v675_v57 = vld [vmem:[%s2559_s10 + $0x7d8] sm:$0xff]  ;;  %v1754_v60 = vpack.c.bf16 %v670_v54, %v666_v52  ;;  %v1111_v38 = vld [vmem:[#allocation9 + $0x2e8] sm:$0xff] (!%p1495_p1) }
 0x12e   : > { %v1028_v46 = vld [vmem:[#allocation9 + $0x50] sm:$0xff] (!%p1495_p1)  ;;  %v1033_v54 = vld [vmem:[#allocation9 + $0x78] sm:$0xff] (!%p1495_p1) }
 0x12f   : > { %1607 = vmatpush1.bf16.msra.mxu0 %v1606_v63  ;;  %v676_v63 = vld [vmem:[%s2559_s10 + $0x7e0] sm:$0xff]  ;;  %v1092_v50 = vld [vmem:[#allocation9 + $0x250] sm:$0xff] (!%p1495_p1)  ;;  %v1770_v51 = vpack.c.bf16 (!%p1495_p1), %v1028_v46, %v1026_v45 }
 0x130   : > { %1735 = vmatpush1.bf16.msra.mxu1 %v1734_v0  ;;  %1609 = vmatprep.subr.bf16.mxu0 %v1608_v1  ;;  %v1756_v0 = vpack.c.bf16 %v679_v58, %v675_v57  ;;  %v674_v1 = vld [vmem:[%s2559_s10 + $0x7d0] sm:$0xff]  ;;  %v1630_v3 = vpack.c.bf16 %v676_v63, %v672_v62  ;;  %v1094_v62 = vld [vmem:[#allocation9 + $0x260] sm:$0xff] (!%p1495_p1) }
 0x131   : > { %1737 = vmatprep.subr.bf16.mxu1 %v1736_v5  ;;  %v1758_v4 = vpack.c.bf16 %v678_v2, %v674_v1  ;;  %v422_v5 = vld [vmem:[%s2551_s14 + $0x10] sm:$0xff]  ;;  %v1037_v1 = vld [vmem:[#allocation9 + $0x98] sm:$0xff] (!%p1495_p1)  ;;  %v1110_v45 = vld [vmem:[#allocation9 + $0x2e0] sm:$0xff] (!%p1495_p1) }
 0x132   : > { %v1032_v58 = vld [vmem:[#allocation9 + $0x70] sm:$0xff] (!%p1495_p1) }
 0x133   : > { %1611 = vmatpush1.bf16.msra.mxu0 %v1610_v11  ;;  %v1096_v63 = vld [vmem:[#allocation9 + $0x270] sm:$0xff] (!%p1495_p1)  ;;  %v1774_v2 = vpack.c.bf16 (!%p1495_p1), %v1032_v58, %v1030_v55  ;;  %v1050_v55 = vld [vmem:[#allocation9 + $0x100] sm:$0xff] (!%p1495_p1) }
 0x134   : > { %1739 = vmatpush1.bf16.msra.mxu1 %v1738_v12  ;;  %1613 = vmatprep.subr.bf16.mxu0 %v1612_v13 }
 0x135   : > { %1741 = vmatprep.subr.bf16.mxu1 %v1740_v17 }
 0x137   : > { %1615 = vmatpush1.bf16.msra.mxu0 %v1614_v23  ;;  %v1083_v23 = vld [vmem:[#allocation9 + $0x208] sm:$0xff] (!%p1495_p1) }
 0x138   : > { %1743 = vmatpush1.bf16.msra.mxu1 %v1742_v24  ;;  %1617 = vmatprep.subr.bf16.mxu0 %v1616_v25  ;;  %v1085_v24 = vld [vmem:[#allocation9 + $0x218] sm:$0xff] (!%p1495_p1)  ;;  %v1762_v25 = vpack.c.bf16 (!%p1495_p1), %v1020_v22, %v1018_v20  ;;  %v1040_v20 = vld [vmem:[#allocation9 + $0xb0] sm:$0xff] (!%p1495_p1) }
 0x139   : > { %1745 = vmatprep.subr.bf16.mxu1 %v1744_v29  ;;  %v1824_v26 = vpack.c.bf16 (!%p1495_p1), %v1085_v24, %v1083_v23  ;;  %v1023_v29 = vld [vmem:[#allocation9 + $0x28] sm:$0xff] (!%p1495_p1)  ;;  %v1104_v23 = vld [vmem:[#allocation9 + $0x2b0] sm:$0xff] (!%p1495_p1)  ;;  %v1782_v28 = vpack.c.bf16 (!%p1495_p1), %v1040_v20, %v1038_v19  ;;  %v1122_v19 = vld [vmem:[#allocation9 + $0x340] sm:$0xff] (!%p1495_p1) }
 0x13a   : > { %v1764_v34 = vpack.c.bf16 (!%p1495_p1), %v1025_v31, %v1023_v29  ;;  %v1043_v24 = vld [vmem:[#allocation9 + $0xc8] sm:$0xff] (!%p1495_p1)  ;;  %v1042_v31 = vld [vmem:[#allocation9 + $0xc0] sm:$0xff] (!%p1495_p1) }
 0x13b   : > { %1619 = vmatpush1.bf16.msra.mxu0 %v1618_v35  ;;  %v1766_v35 = vpack.c.bf16 (!%p1495_p1), %v1024_v33, %v1022_v32  ;;  %v1044_v32 = vld [vmem:[#allocation9 + $0xd0] sm:$0xff] (!%p1495_p1)  ;;  %v1106_v33 = vld [vmem:[#allocation9 + $0x2c0] sm:$0xff] (!%p1495_p1) }
 0x13c   : > { %1747 = vmatpush1.bf16.msra.mxu1 %v1746_v36  ;;  %1621 = vmatprep.subr.bf16.mxu0 %v1620_v37  ;;  %v1087_v36 = vld [vmem:[#allocation9 + $0x228] sm:$0xff] (!%p1495_p1)  ;;  %v1089_v37 = vld [vmem:[#allocation9 + $0x238] sm:$0xff] (!%p1495_p1)  ;;  %v1786_v40 = vpack.c.bf16 (!%p1495_p1), %v1044_v32, %v1042_v31 }
 0x13d   : > { %1749 = vmatprep.subr.bf16.mxu1 %v1748_v41  ;;  %v1828_v39 = vpack.c.bf16 (!%p1495_p1), %v1089_v37, %v1087_v36  ;;  %v1027_v41 = vld [vmem:[#allocation9 + $0x48] sm:$0xff] (!%p1495_p1)  ;;  %v1049_v37 = vld [vmem:[#allocation9 + $0xf8] sm:$0xff] (!%p1495_p1) }
 0x13e   : > { %v1768_v44 = vpack.c.bf16 (!%p1495_p1), %v1029_v42, %v1027_v41  ;;  %v1047_v36 = vld [vmem:[#allocation9 + $0xe8] sm:$0xff] (!%p1495_p1) }
 0x13f   : > { %1623 = vmatpush1.bf16.msra.mxu0 %v1622_v47  ;;  %v1091_v47 = vld [vmem:[#allocation9 + $0x248] sm:$0xff] (!%p1495_p1)  ;;  %v1788_v42 = vpack.c.bf16 (!%p1495_p1), %v1049_v37, %v1047_v36  ;;  %v1069_v37 = vld [vmem:[#allocation9 + $0x198] sm:$0xff] (!%p1495_p1) }
 0x140   : > { %1751 = vmatpush1.bf16.msra.mxu1 %v1750_v48  ;;  %1625 = vmatprep.subr.bf16.mxu0 %v1624_v49  ;;  %v1093_v48 = vld [vmem:[#allocation9 + $0x258] sm:$0xff] (!%p1495_p1)  ;;  %v1090_v49 = vld [vmem:[#allocation9 + $0x240] sm:$0xff] (!%p1495_p1) }
 0x141   : > { %1753 = vmatprep.subr.bf16.mxu1 %v1752_v53  ;;  %v1832_v52 = vpack.c.bf16 (!%p1495_p1), %v1093_v48, %v1091_v47  ;;  %v1031_v53 = vld [vmem:[#allocation9 + $0x68] sm:$0xff] (!%p1495_p1)  ;;  %v1834_v56 = vpack.c.bf16 (!%p1495_p1), %v1092_v50, %v1090_v49  ;;  %v1112_v47 = vld [vmem:[#allocation9 + $0x2f0] sm:$0xff] (!%p1495_p1)  ;;  %v1053_v49 = vld [vmem:[#allocation9 + $0x118] sm:$0xff] (!%p1495_p1) }
 0x142   : > { %v1772_v57 = vpack.c.bf16 (!%p1495_p1), %v1033_v54, %v1031_v53  ;;  %v1051_v48 = vld [vmem:[#allocation9 + $0x108] sm:$0xff] (!%p1495_p1)  ;;  %v1854_v53 = vpack.c.bf16 (!%p1495_p1), %v1112_v47, %v1110_v45 }
 0x143   : > { %1627 = vmatpush1.bf16.msra.mxu0 %v1626_v59  ;;  %v1095_v59 = vld [vmem:[#allocation9 + $0x268] sm:$0xff] (!%p1495_p1)  ;;  %v1792_v54 = vpack.c.bf16 (!%p1495_p1), %v1053_v49, %v1051_v48  ;;  %v1066_v48 = vld [vmem:[#allocation9 + $0x180] sm:$0xff] (!%p1495_p1)  ;;  %v1068_v49 = vld [vmem:[#allocation9 + $0x190] sm:$0xff] (!%p1495_p1) }
 0x144   : > { %1755 = vmatpush1.bf16.msra.mxu1 %v1754_v60  ;;  %1629 = vmatprep.subr.bf16.mxu0 %v1628_v61  ;;  %v1097_v60 = vld [vmem:[#allocation9 + $0x278] sm:$0xff] (!%p1495_p1)  ;;  %v1115_v50 = vld [vmem:[#allocation9 + $0x308] sm:$0xff] (!%p1495_p1) }
 0x145   : > { %1757 = vmatprep.subr.bf16.mxu1 %v1756_v0  ;;  %v1836_v61 = vpack.c.bf16 (!%p1495_p1), %v1097_v60, %v1095_v59  ;;  %v1035_v0 = vld [vmem:[#allocation9 + $0x88] sm:$0xff] (!%p1495_p1)  ;;  %v1116_v59 = vld [vmem:[#allocation9 + $0x310] sm:$0xff] (!%p1495_p1) }
 0x146   : > { %v1055_v60 = vld [vmem:[#allocation9 + $0x128] sm:$0xff] (!%p1495_p1) }
 0x147   : > { %1631 = vmatpush1.bf16.msra.mxu0 %v1630_v3  ;;  %v1099_v3 = vld [vmem:[#allocation9 + $0x288] sm:$0xff] (!%p1495_p1) }
 0x148   : > { %1759 = vmatpush1.bf16.msra.mxu1 %v1758_v4  ;;  %1825 = vmatprep.subr.bf16.mxu0 (!%p1495_p1), %v1824_v26  ;;  %v1101_v4 = vld [vmem:[#allocation9 + $0x298] sm:$0xff] (!%p1495_p1)  ;;  %v1107_v26 = vld [vmem:[#allocation9 + $0x2c8] sm:$0xff] (!%p1495_p1) }
 0x149   : > { %1761 = vmatprep.subr.bf16.mxu1 (!%p1495_p1), %v1760_v21  ;;  %v1102_v21 = vld [vmem:[#allocation9 + $0x2a0] sm:$0xff] (!%p1495_p1) }
 0x14a   : > { %816 = vmatmul.mubr.f32.vlgmr.msra.gmra.mrb[0].mxu0 %v422_v5  ;;  %v1846_v29 = vpack.c.bf16 (!%p1495_p1), %v1104_v23, %v1102_v21  ;;  %v1124_v21 = vld [vmem:[#allocation9 + $0x350] sm:$0xff] (!%p1495_p1)  ;;  %v1065_v23 = vld [vmem:[#allocation9 + $0x178] sm:$0xff] (!%p1495_p1) }
 0x14b   : > { %958 = vmatmul.mubr.f32.vlgmr.msra.gmra.mrb[0].mxu1 %v422_v5  ;;  %1827 = vmatpush1.bf16.msra.mxu0 (!%p1495_p1), %v1826_v30  ;;  %v1838_v5 = vpack.c.bf16 (!%p1495_p1), %v1096_v63, %v1094_v62  ;;  %v1119_v62 = vld [vmem:[#allocation9 + $0x328] sm:$0xff] (!%p1495_p1)  ;;  %v1121_v63 = vld [vmem:[#allocation9 + $0x338] sm:$0xff] (!%p1495_p1)  ;;  %v1866_v31 = vpack.c.bf16 (!%p1495_p1), %v1124_v21, %v1122_v19  ;;  %v1138_v19 = vld [vmem:[#allocation9 + $0x3c0] sm:$0xff] (!%p1495_p1) }
 0x14c   : > { %1763 = vmatpush1.bf16.msra.mxu1 (!%p1495_p1), %v1762_v25  ;;  %1829 = vmatprep.subr.bf16.mxu0 (!%p1495_p1), %v1828_v39  ;;  %v1045_v25 = vld [vmem:[#allocation9 + $0xd8] sm:$0xff] (!%p1495_p1) }
 0x14d   : > { %1765 = vmatprep.subr.bf16.mxu1 (!%p1495_p1), %v1764_v34  ;;  %v1784_v30 = vpack.c.bf16 (!%p1495_p1), %v1045_v25, %v1043_v24  ;;  %v1848_v34 = vpack.c.bf16 (!%p1495_p1), %v1109_v27, %v1107_v26  ;;  %v1113_v39 = vld [vmem:[#allocation9 + $0x2f8] sm:$0xff] (!%p1495_p1)  ;;  %v1127_v24 = vld [vmem:[#allocation9 + $0x368] sm:$0xff] (!%p1495_p1)  ;;  %v1062_v27 = vld [vmem:[#allocation9 + $0x160] sm:$0xff] (!%p1495_p1) }
 0x14e   : > { %v1852_v46 = vpack.c.bf16 (!%p1495_p1), %v1113_v39, %v1111_v38  ;;  %v1129_v25 = vld [vmem:[#allocation9 + $0x378] sm:$0xff] (!%p1495_p1)  ;;  %v1131_v38 = vld [vmem:[#allocation9 + $0x388] sm:$0xff] (!%p1495_p1) }
 0x14f   : > { %1831 = vmatpush1.bf16.msra.mxu0 (!%p1495_p1), %v1830_v43  ;;  %v1046_v43 = vld [vmem:[#allocation9 + $0xe0] sm:$0xff] (!%p1495_p1)  ;;  %v1868_v36 = vpack.c.bf16 (!%p1495_p1), %v1129_v25, %v1127_v24  ;;  %v1133_v39 = vld [vmem:[#allocation9 + $0x398] sm:$0xff] (!%p1495_p1)  ;;  %v1079_v24 = vld [vmem:[#allocation9 + $0x1e8] sm:$0xff] (!%p1495_p1) }
 0x150   : > { %1767 = vmatpush1.bf16.msra.mxu1 (!%p1495_p1), %v1766_v35  ;;  %1833 = vmatprep.subr.bf16.mxu0 (!%p1495_p1), %v1832_v52  ;;  %v1108_v35 = vld [vmem:[#allocation9 + $0x2d0] sm:$0xff] (!%p1495_p1)  ;;  %v1081_v25 = vld [vmem:[#allocation9 + $0x1f8] sm:$0xff] (!%p1495_p1) }
 0x151   : > { %1769 = vmatprep.subr.bf16.mxu1 (!%p1495_p1), %v1768_v44  ;;  %v1850_v41 = vpack.c.bf16 (!%p1495_p1), %v1108_v35, %v1106_v33  ;;  %v1048_v44 = vld [vmem:[#allocation9 + $0xf0] sm:$0xff] (!%p1495_p1)  ;;  %v1126_v33 = vld [vmem:[#allocation9 + $0x360] sm:$0xff] (!%p1495_p1)  ;;  %v1067_v35 = vld [vmem:[#allocation9 + $0x188] sm:$0xff] (!%p1495_p1) }
 0x152   : > { %v1790_v52 = vpack.c.bf16 (!%p1495_p1), %v1048_v44, %v1046_v43  ;;  %v1808_v47 = vpack.c.bf16 (!%p1495_p1), %v1069_v37, %v1067_v35  ;;  %v1080_v35 = vld [vmem:[#allocation9 + $0x1f0] sm:$0xff] (!%p1495_p1) }
 0x153   : > { %1835 = vmatpush1.bf16.msra.mxu0 (!%p1495_p1), %v1834_v56  ;;  %v1052_v56 = vld [vmem:[#allocation9 + $0x110] sm:$0xff] (!%p1495_p1) }
 0x154   : > { %1771 = vmatpush1.bf16.msra.mxu1 (!%p1495_p1), %v1770_v51  ;;  %1837 = vmatprep.subr.bf16.mxu0 (!%p1495_p1), %v1836_v61  ;;  %v1117_v51 = vld [vmem:[#allocation9 + $0x318] sm:$0xff] (!%p1495_p1) }
 0x155   : > { %1773 = vmatprep.subr.bf16.mxu1 (!%p1495_p1), %v1772_v57  ;;  %v1114_v57 = vld [vmem:[#allocation9 + $0x300] sm:$0xff] (!%p1495_p1)  ;;  %v1856_v58 = vpack.c.bf16 (!%p1495_p1), %v1117_v51, %v1115_v50  ;;  %v1057_v61 = vld [vmem:[#allocation9 + $0x138] sm:$0xff] (!%p1495_p1)  ;;  %v1872_v51 = vpack.c.bf16 (!%p1495_p1), %v1133_v39, %v1131_v38  ;;  %v1144_v39 = vld [vmem:[#allocation9 + $0x3f0] sm:$0xff] (!%p1495_p1) }
 0x156   : > { %v1130_v50 = vld [vmem:[#allocation9 + $0x380] sm:$0xff] (!%p1495_p1) }
 0x157   : > { %1839 = vmatpush1.bf16.msra.mxu0 (!%p1495_p1), %v1838_v5  ;;  %v1056_v5 = vld [vmem:[#allocation9 + $0x130] sm:$0xff] (!%p1495_p1)  ;;  %v1142_v38 = vld [vmem:[#allocation9 + $0x3e0] sm:$0xff] (!%p1495_p1) }
 0x158   : > { %1775 = vmatpush1.bf16.msra.mxu1 (!%p1495_p1), %v1774_v2  ;;  %v1858_v2 = vpack.c.bf16 (!%p1495_p1), %v1116_v59, %v1114_v57  ;;  %v1135_v57 = vld [vmem:[#allocation9 + $0x3a8] sm:$0xff] (!%p1495_p1) }
 0x21c   : > { %975 = sbr.rel (%p1495_p1) target bundleno = 988 (0x3dc), region = 80 }
 0x21d   : > { %v817_v9 = vpop.f32.mrb[0].mxu0 }
 0x21e   : > { %v964_v11 = vadd.f32 %v817_v9, %v416_v6  ;;  %v959_v12 = vpop.f32.mrb[0].mxu1  ;;  %v819_v13 = vpop.f32.mrb[1].mxu0  ;;  %v1776_v6 = vpack.c.bf16 (!%p1495_p1), %v1037_v1, %v1035_v0  ;;  %v1098_v9 = vld [vmem:[#allocation9 + $0x280] sm:$0xff] (!%p1495_p1)  ;;  %v1794_v0 = vpack.c.bf16 (!%p1495_p1), %v1052_v56, %v1050_v55  ;;  %v982_v1 = vlaneseq (!%p1495_p1) }
 0x21f   : > { %v966_v14 = vadd.f32 %v959_v12, %v418_v7  ;;  %v965_v15 = vadd.f32 %v819_v13, %v417_v8  ;;  %v961_v16 = vpop.f32.mrb[1].mxu1  ;;  %v1034_v7 = vld [vmem:[#allocation9 + $0x80] sm:$0xff] (!%p1495_p1)  ;;  %v1036_v8 = vld [vmem:[#allocation9 + $0x90] sm:$0xff] (!%p1495_p1)  ;;  %v1039_v12 = vld [vmem:[#allocation9 + $0xa8] sm:$0xff] (!%p1495_p1) }
 0x220   : > { %968 = vst [vmem:[#allocation2] sm:$0xff] %v964_v11  ;;  %v967_v17 = vadd.f32 %v961_v16, %v419_v10  ;;  %v1840_v10 = vpack.c.bf16 (!%p1495_p1), %v1101_v4, %v1099_v3  ;;  %v1100_v11 = vld [vmem:[#allocation9 + $0x290] sm:$0xff] (!%p1495_p1)  ;;  %v1041_v13 = vld [vmem:[#allocation9 + $0xb8] sm:$0xff] (!%p1495_p1)  ;;  %v1778_v16 = vpack.c.bf16 (!%p1495_p1), %v1036_v8, %v1034_v7  ;;  %1777 = vmatprep.subr.bf16.mxu1 (!%p1495_p1), %v1776_v6  ;;  %v1054_v4 = vld [vmem:[#allocation9 + $0x120] sm:$0xff] (!%p1495_p1) }
 0x221   : > { %970 = vst [vmem:[#allocation2 + $0x10] sm:$0xff] %v966_v14  ;;  %969 = vst [vmem:[#allocation2 + $0x8] sm:$0xff] %v965_v15  ;;  %v1103_v14 = vld [vmem:[#allocation9 + $0x2a8] sm:$0xff] (!%p1495_p1)  ;;  %v1105_v15 = vld [vmem:[#allocation9 + $0x2b8] sm:$0xff] (!%p1495_p1)  ;;  %v1780_v18 = vpack.c.bf16 (!%p1495_p1), %v1041_v13, %v1039_v12  ;;  %v1796_v3 = vpack.c.bf16 (!%p1495_p1), %v1057_v61, %v1055_v60  ;;  %v1860_v7 = vpack.c.bf16 (!%p1495_p1), %v1121_v63, %v1119_v62 }
 0x222   : > { %971 = vst [vmem:[#allocation2 + $0x18] sm:$0xff] %v967_v17  ;;  %v1842_v17 = vpack.c.bf16 (!%p1495_p1), %v1100_v11, %v1098_v9  ;;  %1841 = vmatprep.subr.bf16.mxu0 (!%p1495_p1), %v1840_v10  ;;  %v1844_v22 = vpack.c.bf16 (!%p1495_p1), %v1105_v15, %v1103_v14  ;;  %1779 = vmatpush1.bf16.msra.mxu1 (!%p1495_p1), %v1778_v16  ;;  %v1118_v6 = vld [vmem:[#allocation9 + $0x320] sm:$0xff] (!%p1495_p1)  ;;  %v1120_v8 = vld [vmem:[#allocation9 + $0x330] sm:$0xff] (!%p1495_p1)  ;;  %v1059_v9 = vld [vmem:[#allocation9 + $0x148] sm:$0xff] (!%p1495_p1)  ;;  %v2839_v14 = vshrl.u32 (!%p1495_p1), %v982_v1, 7 }
 0x223   : > { %1781 = vmatprep.subr.bf16.mxu1 %v1780_v18  ;;  %v1061_v10 = vld [vmem:[#allocation9 + $0x158] sm:$0xff]  ;;  %v1123_v11 = vld [vmem:[#allocation9 + $0x348] sm:$0xff]  ;;  %v1798_v13 = vpack.c.bf16 %v1056_v5, %v1054_v4  ;;  %v1862_v15 = vpack.c.bf16 %v1120_v8, %v1118_v6  ;;  %v1060_v18 = vld [vmem:[#allocation9 + $0x150] sm:$0xff]  ;;  %v1810_v60 = vpack.c.bf16 %v1068_v49, %v1066_v48 }
 0x224   : > { %1843 = vmatpush1.bf16.msra.mxu0 %v1842_v17  ;;  %v1125_v12 = vld [vmem:[#allocation9 + $0x358] sm:$0xff]  ;;  %v1800_v16 = vpack.c.bf16 %v1061_v10, %v1059_v9  ;;  %v1058_v17 = vld [vmem:[#allocation9 + $0x140] sm:$0xff]  ;;  %v2851_v59 = vsub.s32 0, %v2839_v14  ;;  %v992_v62 = vsub.s32 2, %v2839_v14  ;;  %v1136_v6 = vld [vmem:[#allocation9 + $0x3b0] sm:$0xff] }
 0x225   : > { %1845 = vmatprep.subr.bf16.mxu0 %v1844_v22  ;;  %v1864_v20 = vpack.c.bf16 %v1125_v12, %v1123_v11  ;;  %v1063_v22 = vld [vmem:[#allocation9 + $0x168] sm:$0xff]  ;;  %v1802_v26 = vpack.c.bf16 %v1060_v18, %v1058_v17  ;;  %v1070_v1 = vld [vmem:[#allocation9 + $0x1a0] sm:$0xff]  ;;  %v1077_v8 = vld [vmem:[#allocation9 + $0x1d8] sm:$0xff] }
 0x226   : > { %1783 = vmatpush1.bf16.msra.mxu1 %v1782_v28  ;;  %v1064_v28 = vld [vmem:[#allocation9 + $0x170] sm:$0xff]  ;;  %v1804_v32 = vpack.c.bf16 %v1065_v23, %v1063_v22  ;;  %v1139_v10 = vld [vmem:[#allocation9 + $0x3c8] sm:$0xff]  ;;  %v1141_v11 = vld [vmem:[#allocation9 + $0x3d8] sm:$0xff] }
 0x227   : > { %1785 = vmatprep.subr.bf16.mxu1 %v1784_v30  ;;  %v996_v30 = vsub.s32 3, %v2839_v14  ;;  %v1806_v43 = vpack.c.bf16 %v1064_v28, %v1062_v27  ;;  %v976_v21 = vld [vmem:[#allocation2] sm:$0xff]  ;;  %v1880_v23 = vpack.c.bf16 %v1141_v11, %v1139_v10  ;;  %v1143_v27 = vld [vmem:[#allocation9 + $0x3e8] sm:$0xff] }
 0x228   : > { %1847 = vmatpush1.bf16.msra.mxu0 %v1846_v29  ;;  %v2842_v29 = vsub.s32 1, %v2839_v14  ;;  %v1074_v14 = vld [vmem:[#allocation9 + $0x1c0] sm:$0xff]  ;;  %v1145_v28 = vld [vmem:[#allocation9 + $0x3f8] sm:$0xff] }
 0x229   : > { %1849 = vmatprep.subr.bf16.mxu0 %v1848_v34  ;;  %v1128_v34 = vld [vmem:[#allocation9 + $0x370] sm:$0xff]  ;;  %v1884_v37 = vpack.c.bf16 %v1145_v28, %v1143_v27 }
 0x22a   : > { %1787 = vmatpush1.bf16.msra.mxu1 %v1786_v40  ;;  %v977_v40 = vld [vmem:[#allocation2 + $0x8] sm:$0xff] }
 0x22b   : > { %1789 = vmatprep.subr.bf16.mxu1 %v1788_v42  ;;  %v979_v42 = vld [vmem:[#allocation2 + $0x18] sm:$0xff] }
 0x22c   : > { %1851 = vmatpush1.bf16.msra.mxu0 %v1850_v41  ;;  %v2845_v41 = vld [vmem:[#allocation8] sm:$0xf] }
 0x22d   : > { %1853 = vmatprep.subr.bf16.mxu0 %v1852_v46  ;;  %v989_v44 = vrot.slane %v2845_v41, %v2842_v29  ;;  %v997_v45 = vrot.slane %v2845_v41, %v996_v30  ;;  %v1870_v46 = vpack.c.bf16 %v1128_v34, %v1126_v33  ;;  %v993_v22 = vrot.slane %v2845_v41, %v992_v62  ;;  %v1078_v34 = vld [vmem:[#allocation9 + $0x1e0] sm:$0xff] }
 0x22e   : > { %1791 = vmatpush1.bf16.msra.mxu1 %v1790_v52  ;;  %v1132_v52 = vld [vmem:[#allocation9 + $0x390] sm:$0xff]  ;;  %v1820_v33 = vpack.c.bf16 %v1081_v25, %v1079_v24 }
 0x22f   : > { %1793 = vmatprep.subr.bf16.mxu1 %v1792_v54  ;;  %v1073_v54 = vld [vmem:[#allocation9 + $0x1b8] sm:$0xff]  ;;  %v1003_v55 = vadd.f32 %v989_v44, %v977_v40  ;;  %v1005_v56 = vadd.f32 %v997_v45, %v979_v42  ;;  %v1874_v63 = vpack.c.bf16 %v1132_v52, %v1130_v50  ;;  %v1822_v40 = vpack.c.bf16 %v1080_v35, %v1078_v34 }
 0x230   : > { %1855 = vmatpush1.bf16.msra.mxu0 %v1854_v53  ;;  %v1071_v53 = vld [vmem:[#allocation9 + $0x1a8] sm:$0xff]  ;;  %v1886_v42 = vpack.c.bf16 %v1144_v39, %v1142_v38 }
 0x231   : > { %1857 = vmatprep.subr.bf16.mxu0 %v1856_v58  ;;  %v1137_v58 = vld [vmem:[#allocation9 + $0x3b8] sm:$0xff]  ;;  %vm1007_vm0 = vcmp.ge.f32.partialorder %v1003_v55, 0.0  ;;  %v1011_v61 = vmul.f32 0.2, %v1003_v55  ;;  %vm1009_vm1 = vcmp.ge.f32.partialorder %v1005_v56, 0.0 }
 0x232   : > { %1795 = vmatpush1.bf16.msra.mxu1 %v1794_v0  ;;  %v1812_v0 = vpack.c.bf16 %v1073_v54, %v1071_v53  ;;  %v1013_v4 = vmul.f32 0.2, %v1005_v56  ;;  %v1876_v5 = vpack.c.bf16 %v1137_v58, %v1135_v57  ;;  %v1306_v53 = vld [vmem:[#allocation12] sm:$0x3] }
 0x233   : > { %1797 = vmatprep.subr.bf16.mxu1 %v1796_v3  ;;  %v1134_v3 = vld [vmem:[#allocation9 + $0x3a0] sm:$0xff]  ;;  %v1015_v9 = vsel %vm1007_vm0, %v1003_v55, %v1011_v61  ;;  %v1311_v58 = vrot.slane %v1306_v53, %v2851_v59  ;;  %v1315_v61 = vrot.slane %v1306_v53, %v2842_v29 }
 0x234   : > { %1859 = vmatpush1.bf16.msra.mxu0 %v1858_v2  ;;  %v1072_v2 = vld [vmem:[#allocation9 + $0x1b0] sm:$0xff]  ;;  %1222 = vmatprep.mubr.f32.mxu1 %v1015_v9  ;;  %v1017_v12 = vsel %vm1009_vm1, %v1005_v56, %v1013_v4  ;;  %v1878_v17 = vpack.c.bf16 %v1136_v6, %v1134_v3  ;;  %v1496_v4 = vld [vmem:[#allocation3] ss:$0 sm:$0xff] }
 0x235   : > { %1861 = vmatprep.subr.bf16.mxu0 %v1860_v7  ;;  %v1075_v7 = vld [vmem:[#allocation9 + $0x1c8] sm:$0xff]  ;;  %1293 = vmatprep.mubr.f32.mxu0 %v1017_v12 }
 0x236   : > { %1799 = vmatpush1.bf16.msra.mxu1 %v1798_v13  ;;  %v1814_v13 = vpack.c.bf16 %v1072_v2, %v1070_v1  ;;  %v1816_v18 = vpack.c.bf16 %v1077_v8, %v1075_v7 }
 0x237   : > { %1801 = vmatprep.subr.bf16.mxu1 %v1800_v16  ;;  %v985_v16 = vrot.slane %v2845_v41, %v2851_v59 }
 0x238   : > { %1863 = vmatpush1.bf16.msra.mxu0 %v1862_v15  ;;  %v1076_v15 = vld [vmem:[#allocation9 + $0x1d0] sm:$0xff] }
 0x239   : > { %1865 = vmatprep.subr.bf16.mxu0 %v1864_v20  ;;  %v1140_v20 = vld [vmem:[#allocation9 + $0x3d0] sm:$0xff]  ;;  %v1818_v30 = vpack.c.bf16 %v1076_v15, %v1074_v14 }
 0x23a   : > { %1803 = vmatpush1.bf16.msra.mxu1 %v1802_v26  ;;  %v978_v26 = vld [vmem:[#allocation2 + $0x10] sm:$0xff] }
 0x23b   : > { %1805 = vmatprep.subr.bf16.mxu1 %v1804_v32  ;;  %v1882_v32 = vpack.c.bf16 %v1140_v20, %v1138_v19 }
 0x23c   : > { %1867 = vmatpush1.bf16.msra.mxu0 %v1866_v31  ;;  %v1002_v31 = vadd.f32 %v985_v16, %v976_v21 }
 0x23d   : > { %1869 = vmatprep.subr.bf16.mxu0 %v1868_v36  ;;  %v1004_v36 = vadd.f32 %v993_v22, %v978_v26 }
 0x23e   : > { %1807 = vmatpush1.bf16.msra.mxu1 %v1806_v43  ;;  %v1010_v41 = vmul.f32 0.2, %v1002_v31  ;;  %vm1006_vm2 = vcmp.ge.f32.partialorder %v1002_v31, 0.0 }
 0x23f   : > { %1809 = vmatprep.subr.bf16.mxu1 %v1808_v47  ;;  %v1012_v43 = vmul.f32 0.2, %v1004_v36  ;;  %vm1008_vm3 = vcmp.ge.f32.partialorder %v1004_v36, 0.0 }
 0x240   : > { %1871 = vmatpush1.bf16.msra.mxu0 %v1870_v46  ;;  %v1014_v44 = vsel %vm1006_vm2, %v1002_v31, %v1010_v41  ;;  %v1146_v46 = vld [vmem:[#allocation11] sm:$0x3] }
 0x241   : > { %1873 = vmatprep.subr.bf16.mxu0 %v1872_v51  ;;  %v1016_v45 = vsel %vm1008_vm3, %v1004_v36, %v1012_v43  ;;  %v1151_v47 = vrot.slane %v1146_v46, %v2851_v59  ;;  %v1155_v48 = vrot.slane %v1146_v46, %v2842_v29 }
 0x242   : > { %1811 = vmatpush1.bf16.msra.mxu1 %v1810_v60 }
 0x243   : > { %1813 = vmatprep.subr.bf16.mxu1 %v1812_v0 }
 0x244   : > { %1875 = vmatpush1.bf16.msra.mxu0 %v1874_v63 }
 0x245   : > { %1877 = vmatprep.subr.bf16.mxu0 %v1876_v5 }
 0x246   : > { %1815 = vmatpush1.bf16.msra.mxu1 %v1814_v13 }
 0x247   : > { %1817 = vmatprep.subr.bf16.mxu1 %v1816_v18 }
 0x248   : > { %1879 = vmatpush1.bf16.msra.mxu0 %v1878_v17 }
 0x249   : > { %1881 = vmatprep.subr.bf16.mxu0 %v1880_v23 }
 0x24a   : > { %1819 = vmatpush1.bf16.msra.mxu1 %v1818_v30 }
 0x24b   : > { %1821 = vmatprep.subr.bf16.mxu1 %v1820_v33 }
 0x24c   : > { %1883 = vmatpush1.bf16.msra.mxu0 %v1882_v32 }
 0x24d   : > { %1885 = vmatprep.subr.bf16.mxu0 %v1884_v37 }
 0x24e   : > { %1823 = vmatpush1.bf16.msra.mxu1 %v1822_v40 }
 0x250   : > { %1887 = vmatpush1.bf16.msra.mxu0 %v1886_v42 }
 0x251   : > { %1223 = vmatmul.mubr.f32.vlgmr.msra.gmra.mrb[0].mxu1 %v1014_v44 }
 0x253   : > { %1294 = vmatmul.mubr.f32.vlgmr.msra.gmra.mrb[0].mxu0 %v1016_v45 }
 0x324   : > { %v1224_v49 = vpop.f32.mrb[0].mxu1 }
 0x325   : > { %v1225_v50 = vadd.f32 %v1224_v49, %v1151_v47  ;;  %v1226_v51 = vpop.f32.mrb[1].mxu1 }
 0x326   : > { %v1295_v52 = vpop.f32.mrb[0].mxu0  ;;  %v1227_v54 = vadd.f32 %v1226_v51, %v1155_v48 }
 0x327   : > { %v1297_v55 = vpop.f32.mrb[1].mxu0  ;;  %v1296_v56 = vadd.f32 %v1295_v52, %v1225_v50 }
 0x328   : > { %v1298_v57 = vadd.f32 %v1297_v55, %v1227_v54 }
 0x329   : > { %vm1300_vm4 = vcmp.ge.f32.partialorder %v1296_v56, 0.0  ;;  %v1302_v60 = vmul.f32 0.2, %v1296_v56 }
 0x32a   : > { %vm1301_vm5 = vcmp.ge.f32.partialorder %v1298_v57, 0.0  ;;  %v1303_v62 = vmul.f32 0.2, %v1298_v57 }
 0x32b   : > { %v1304_v63 = vsel %vm1300_vm4, %v1296_v56, %v1302_v60 }
 0x32c   : > { %v1305_v0 = vsel %vm1301_vm5, %v1298_v57, %v1303_v62  ;;  %v1318_v1 = vmul.f32 %v1311_v58, %v1304_v63 }
 0x32d   : > { %v1319_v2 = vmul.f32 %v1315_v61, %v1305_v0 }
 0x32f   : > { %v1320_v3 = vadd.f32 %v1319_v2, %v1318_v1 }
 0x331   : > { %1321 = vadd.xlane.f32.xlu0 %v1320_v3 }
 0x3be   : > { %v1322_v5 = vpop.xlane.xlu0 %1321 }
 0x3bf   : > { %v1330_v6 = vadd.f32 %v1496_v4, %v1322_v5 }
 0x3c1   : > { %v1497_v7 = vmul.f32 -1.442695, %v1330_v6 }
 0x3c3   : > { %2002 = vpow2.f32 %v1497_v7 }
 0x3cd   : > { %v2003_v8 = vpop.eup %2002 }
 0x3ce   : > { %v1334_v9 = vadd.f32 1.0, %v2003_v8 }
 0x3d0   : > { %2004 = vrcp.f32 %v1334_v9 }
 0x3da   : > { %v2005_v59 = vpop.eup %2004 }
 0x3db   : > { %1338 = vst.msk [vmem:[%s2890_s7] sm:$0xff] %vm1337_vm6, %v2005_v59 }
 0x3dc PF: > { %s27_s8 = sadd.s32 1, %s2244_s8   ;;  %s2908_s26 = smov %s2228_s27 }
 0x3dd   : > { %p24_p13 = scmp.ge.s32.totalorder %s27_s8, 4   ;;  %s2909_s27 = smov %s2232_s28 }
 0x3de   : > { %s2910_s28 = smov %s2466_s20  ;;  %s2911_s29 = smov %s2240_s30 }
 0x3df   : > { %s2912_s30 = smov %s2914_s23  ;;  %26 = sbr.rel (!%p24_p13) target bundleno = 11 (0xb), region = 125 }
 0x3e6   :  { %1358 = vsyncpa [#allocation5], 1 }
 0x3e7   :  { %1360 = vsyncpa [#allocation5 + $0x1], 1 }
 0x3e8   :  { %1361 = vsyncpa [#allocation7], 1 }
 0x3e9   :  { %1363 = vsyncpa [#allocation7 + $0x1], 1 }
 0x3ea   :  { %1364 = vsyncpa [#allocation10], 1 }
 0x3eb   :  { %1365 = vsyncpa [#allocation13], 1 }

</bundles_post_ra>
